<compile_context>
chip_gen: v7x
topology: tpu7x:2x2x1
jax: 0.10.0
libtpu: 0.0.40
codegen_flags: <defaults>
</compile_context>

<pallas_src>
import functools

import jax
import jax.numpy as jnp
from jax.experimental import pallas as pl
from jax.experimental.pallas import tpu as pltpu

ELMO_DIM = 1024  # real model dim; the demo below uses a smaller stand-in
BN_EPS = 1e-5


def elmo_dan_kernel(l0_ref, l1_ref, len_ref,
                    w1a_ref, w1b_ref, b1_ref, w2_ref, b2_ref,
                    out_ref,
                    acc0_ref, acc1_ref):
    j = pl.program_id(1)

    # --- init pooled-sum accumulators at the first time tile -----------------
    @pl.when(j == 0)
    def _():
        acc0_ref[...] = jnp.zeros_like(acc0_ref)
        acc1_ref[...] = jnp.zeros_like(acc1_ref)

    # --- streamed bf16 tile -> f32 time-sum (accumulator dtype on the reduce,
    #     no full-tile f32 temporary) ------------------------------------------
    acc0_ref[...] += jnp.sum(l0_ref[...], axis=1, dtype=jnp.float32)
    acc1_ref[...] += jnp.sum(l1_ref[...], axis=1, dtype=jnp.float32)

    # --- classifier epilogue, once per batch tile (last time tile) -----------
    @pl.when(j == pl.num_programs(1) - 1)
    def _():
        # mean pooling: sum / lengths  (approx reciprocal -> EUP slot)
        inv_len = pl.reciprocal(len_ref[...], approx=True)        # [bm, 1]
        pooled0 = (acc0_ref[...] * inv_len).astype(jnp.bfloat16)  # [bm, D]
        pooled1 = (acc1_ref[...] * inv_len).astype(jnp.bfloat16)  # [bm, D]

        # concat([p0, p1]) @ W1  ==  p0 @ W1[:D] + p1 @ W1[D:]
        h = (jnp.dot(pooled0, w1a_ref[...], preferred_element_type=jnp.float32)
             + jnp.dot(pooled1, w1b_ref[...], preferred_element_type=jnp.float32)
             + b1_ref[...])                                        # [bm, H]
        h = jnp.maximum(h, 0.0).astype(jnp.bfloat16)

        # BatchNorm1d (inference, running stats) and b2 are pre-folded into
        # W2' / b2' in the wrapper.  Dropout = identity in eval mode.
        out = (jnp.dot(h, w2_ref[...], preferred_element_type=jnp.float32)
               + b2_ref[...])                                      # [bm, C]
        out_ref[...] = out.astype(out_ref.dtype)


def _round_up(x, m):
    return ((x + m - 1) // m) * m


def _cdiv(a, b):
    return (a + b - 1) // b


def _vmem_need_bytes(bm, bt, D, H, C):
    stream = 2 * 2 * bm * bt * D * 2        # 2 streamed inputs x 2 buffers x bf16
    weights = 2 * (2 * D * H + H * C) * 2   # bf16 W1 halves + W2', double-buffered
    small = 2 * 4 * (H + C + bm)            # b1, b2', lengths (f32), double-buffered
    out = 2 * bm * C * 4
    scratch = 2 * bm * D * 4                # two f32 accumulators
    return stream + weights + small + out + scratch


@functools.partial(jax.jit, static_argnames=("bm", "bt"))
def elmo_dan_forward(layer0, layer1, lengths, params, bm=32, bt=64):
    """layer0/layer1: [B, T, D]; lengths: [B, 1]; returns [B, C] f32."""
    w1, b1, w2, b2, gamma, beta, r_mean, r_var = params
    B, T, D = layer0.shape
    H = w1.shape[1]
    C = w2.shape[1]

    # ---- per-generation VMEM budget (v5e/v6e: 128 MiB phys, v7x: 64 MiB/TC) --
    kind = jax.devices()[0].device_kind.lower()
    cap = (100 if ("v5" in kind or "v6" in kind) else 48) * 1024 * 1024

    # ---- tile sizing: clamp to data, keep >=2 batch tiles, fit VMEM budget ---
    bm = max(8, min(int(bm), _round_up(B, 8)))
    bt = max(16, min(int(bt), _round_up(T, 16)))   # bf16 sublane packing: bt % 16 == 0
    while bm > 8 and _cdiv(B, bm) < 2:             # keep both v7x TensorCores busy
        bm = max(8, (bm // 2 // 8) * 8)
    while bt > 16 and _vmem_need_bytes(bm, bt, D, H, C) > int(0.75 * cap):
        bt = max(16, (bt // 2 // 16) * 16)
    while bm > 8 and _vmem_need_bytes(bm, bt, D, H, C) > int(0.75 * cap):
        bm = max(8, (bm // 2 // 8) * 8)

    vmem_limit = int(min(cap, max(32 * 1024 * 1024,
                                  int(1.5 * _vmem_need_bytes(bm, bt, D, H, C)))))

    # ---- ragged batch / time: pad so tiles divide evenly ---------------------
    # Zero time-padding is exact: the module sums over all T (no mask) and
    # divides by lengths, so extra zero rows do not change the result.
    B_pad, T_pad = _round_up(B, bm), _round_up(T, bt)
    l0 = layer0.astype(jnp.bfloat16)
    l1 = layer1.astype(jnp.bfloat16)
    lengths = lengths.astype(jnp.float32)
    if B_pad != B or T_pad != T:
        pad3 = ((0, B_pad - B), (0, T_pad - T), (0, 0))
        l0 = jnp.pad(l0, pad3)
        l1 = jnp.pad(l1, pad3)
        lengths = jnp.pad(lengths, ((0, B_pad - B), (0, 0)), constant_values=1.0)

    # ---- parameter prep: split W1, fold BatchNorm + b2 into W2'/b2', bf16 ----
    w1a = w1[:D, :].astype(jnp.bfloat16)
    w1b = w1[D:, :].astype(jnp.bfloat16)
    bn_scale = gamma / jnp.sqrt(r_var + BN_EPS)
    w2f = (w2 * bn_scale).astype(jnp.bfloat16)
    b2f = ((b2 - r_mean) * bn_scale + beta).astype(jnp.float32)
    b1f = b1.astype(jnp.float32)

    grid = (B_pad // bm, T_pad // bt)
    stream_spec = pl.BlockSpec((bm, bt, D), lambda i, j: (i, j, 0))
    len_spec = pl.BlockSpec((bm, 1), lambda i, j: (i, 0))

    def full2d(shape):
        return pl.BlockSpec(shape, lambda i, j: (0, 0))

    out_pad = pl.pallas_call(
        elmo_dan_kernel,
        out_shape=jax.ShapeDtypeStruct((B_pad, C), jnp.float32),
        grid_spec=pltpu.PrefetchScalarGridSpec(
            num_scalar_prefetch=0,
            grid=grid,
            in_specs=[
                stream_spec,        # layer0  [B_pad, T_pad, D] (bf16)
                stream_spec,        # layer1  [B_pad, T_pad, D] (bf16)
                len_spec,           # lengths [B_pad, 1] (f32)
                full2d((D, H)),     # W1[:D]  (bf16)
                full2d((D, H)),     # W1[D:]  (bf16)
                full2d((1, H)),     # b1      (f32)
                full2d((H, C)),     # W2' = W2 * gamma/sqrt(var+eps)  (bf16)
                full2d((1, C)),     # b2' = (b2 - mean)*scale + beta  (f32)
            ],
            out_specs=pl.BlockSpec((bm, C), lambda i, j: (i, 0)),
            scratch_shapes=[pltpu.VMEM((bm, D), jnp.float32),
                            pltpu.VMEM((bm, D), jnp.float32)],
        ),
        compiler_params=pltpu.CompilerParams(
            dimension_semantics=("parallel", "arbitrary"),
            vmem_limit_bytes=vmem_limit),
    )(l0, l1, lengths, w1a, w1b, b1f, w2f, b2f)

    return out_pad[:B]


def reference_forward_f32(layer0, layer1, lengths, params):
    """Plain-JAX f32 mirror of the PyTorch forward (eval mode)."""
    w1, b1, w2, b2, gamma, beta, r_mean, r_var = params
    p0 = jnp.sum(layer0.astype(jnp.float32), axis=1) / lengths
    p1 = jnp.sum(layer1.astype(jnp.float32), axis=1) / lengths
    feat = jnp.concatenate([p0, p1], axis=1)
    h = jnp.maximum(feat @ w1 + b1, 0.0)
    logits = h @ w2 + b2
    return (logits - r_mean) / jnp.sqrt(r_var + BN_EPS) * gamma + beta


def reference_matched(layer0, layer1, lengths, params):
    """Reference with the same bf16 casts / BN folding the kernel uses."""
    w1, b1, w2, b2, gamma, beta, r_mean, r_var = params
    D = layer0.shape[-1]
    f32 = jnp.float32
    l0 = layer0.astype(jnp.bfloat16).astype(f32)
    l1 = layer1.astype(jnp.bfloat16).astype(f32)
    p0 = jnp.sum(l0, axis=1) / lengths
    p1 = jnp.sum(l1, axis=1) / lengths
    w1a = w1[:D].astype(jnp.bfloat16).astype(f32)
    w1b = w1[D:].astype(jnp.bfloat16).astype(f32)
    scale = gamma / jnp.sqrt(r_var + BN_EPS)
    w2f = (w2 * scale).astype(jnp.bfloat16).astype(f32)
    b2f = (b2 - r_mean) * scale + beta
    p0b = p0.astype(jnp.bfloat16).astype(f32)
    p1b = p1.astype(jnp.bfloat16).astype(f32)
    h = jnp.maximum(p0b @ w1a + p1b @ w1b + b1, 0.0)
    hb = h.astype(jnp.bfloat16).astype(f32)
    return hb @ w2f + b2f


if __name__ == "__main__":
    # Small stand-in shapes (real ELMO_DIM = 1024; the kernel is shape-generic).
    B, T, D = 16, 40, 256     # batch, seq (non-divisible -> exercises padding), feat dim
    H, C = 128, 16            # n_hidden_units, n_classes

    key = jax.random.PRNGKey(0)
    k = jax.random.split(key, 11)

    # "ELMo representations" (kernel inputs; see TODO at the top).
    layer0 = jax.random.normal(k[0], (B, T, D), dtype=jnp.float32)
    layer1 = jax.random.normal(k[1], (B, T, D), dtype=jnp.float32)
    lengths = jax.random.randint(k[2], (B, 1), 1, T + 1).astype(jnp.float32)

    # Deterministic synthetic parameters (shapes from the module __init__).
    w1 = 0.02 * jax.random.normal(k[3], (2 * D, H), dtype=jnp.float32)
    b1 = 0.02 * jax.random.normal(k[4], (1, H), dtype=jnp.float32)
    w2 = 0.02 * jax.random.normal(k[5], (H, C), dtype=jnp.float32)
    b2 = 0.02 * jax.random.normal(k[6], (1, C), dtype=jnp.float32)
    gamma = 1.0 + 0.1 * jax.random.normal(k[7], (1, C), dtype=jnp.float32)
    beta = 0.1 * jax.random.normal(k[8], (1, C), dtype=jnp.float32)
    r_mean = 0.05 * jax.random.normal(k[9], (1, C), dtype=jnp.float32)
    r_var = 0.9 + 0.1 * jnp.abs(jax.random.normal(k[10], (1, C), dtype=jnp.float32))
    params = (w1, b1, w2, b2, gamma, beta, r_mean, r_var)

    ref_matched = reference_matched(layer0, layer1, lengths, params)
    ref_f32 = reference_forward_f32(layer0, layer1, lengths, params)

    # Production-oriented defaults (auto-clamped to the small demo shapes) ...
    out_a = jax.block_until_ready(elmo_dan_forward(layer0, layer1, lengths, params))
    # ... and explicit small tiles to exercise the multi-step time reduction.
    out_b = jax.block_until_ready(
        elmo_dan_forward(layer0, layer1, lengths, params, bm=8, bt=16))

    for out in (out_a, out_b):
        assert out.shape == (B, C)
        assert jnp.allclose(out, ref_matched, rtol=2e-2, atol=2e-2), (
            f"max abs diff vs matched ref: {jnp.max(jnp.abs(out - ref_matched))}")
        assert jnp.allclose(out, ref_f32, rtol=1e-1, atol=1e-1), (
            f"max abs diff vs f32 ref: {jnp.max(jnp.abs(out - ref_f32))}")

    print("KERNEL_OK")
</pallas_src>

<mosaic_0001>
module attributes {stable_mosaic.version = 11 : i64} {
  func.func @elmo_dan_kernel(%arg0: i32, %arg1: i32, %arg2: memref<8x48x256xbf16, #tpu.memory_space<vmem>>, %arg3: memref<8x48x256xbf16, #tpu.memory_space<vmem>>, %arg4: memref<8x1xf32, #tpu.memory_space<vmem>>, %arg5: memref<256x128xbf16, #tpu.memory_space<vmem>>, %arg6: memref<256x128xbf16, #tpu.memory_space<vmem>>, %arg7: memref<1x128xf32, #tpu.memory_space<vmem>>, %arg8: memref<128x16xbf16, #tpu.memory_space<vmem>>, %arg9: memref<1x16xf32, #tpu.memory_space<vmem>>, %arg10: memref<8x16xf32, #tpu.memory_space<vmem>>, %arg11: memref<8x256xf32, #tpu.memory_space<vmem>>, %arg12: memref<8x256xf32, #tpu.memory_space<vmem>>) attributes {dimension_semantics = [#tpu.dimension_semantics<parallel>, #tpu.dimension_semantics<arbitrary>], iteration_bounds = array<i64: 2, 1>, scalar_prefetch = 0 : i64, scratch_operands = 2 : i64, tpu.core_type = #tpu.core_type<tc>, window_params = [{transform_indices = @transform_0, window_bounds = array<i64: 8, 48, 256>}, {transform_indices = @transform_1, window_bounds = array<i64: 8, 48, 256>}, {transform_indices = @transform_2, window_bounds = array<i64: 8, 1>}, {pipeline_mode = #tpu.pipeline_mode<synchronous>, transform_indices = @transform_3, window_bounds = array<i64: 256, 128>}, {pipeline_mode = #tpu.pipeline_mode<synchronous>, transform_indices = @transform_4, window_bounds = array<i64: 256, 128>}, {pipeline_mode = #tpu.pipeline_mode<synchronous>, transform_indices = @transform_5, window_bounds = array<i64: 1, 128>}, {pipeline_mode = #tpu.pipeline_mode<synchronous>, transform_indices = @transform_6, window_bounds = array<i64: 128, 16>}, {pipeline_mode = #tpu.pipeline_mode<synchronous>, transform_indices = @transform_7, window_bounds = array<i64: 1, 16>}, {transform_indices = @transform_8, window_bounds = array<i64: 8, 16>}]} {
    %c0_i32 = arith.constant 0 : i32
    %0 = arith.cmpi eq, %arg1, %c0_i32 : i32
    %1 = arith.extui %0 : i1 to i32
    %c0_i32_0 = arith.constant 0 : i32
    %2 = arith.cmpi ne, %1, %c0_i32_0 : i32
    scf.if %2 {
      %cst_17 = arith.constant 0.000000e+00 : f32
      %18 = vector.broadcast %cst_17 : f32 to vector<8x256xf32>
      %c0_18 = arith.constant 0 : index
      %c0_19 = arith.constant 0 : index
      %19 = vector.load %arg11[%c0_18, %c0_19] : memref<8x256xf32, #tpu.memory_space<vmem>>, vector<8x256xf32>
      tpu.vector_store %arg11[%c0_18, %c0_19], %18 {strides = array<i32>} : memref<8x256xf32, #tpu.memory_space<vmem>>, vector<8x256xf32>,
      %cst_20 = arith.constant 0.000000e+00 : f32
      %20 = vector.broadcast %cst_20 : f32 to vector<8x256xf32>
      %c0_21 = arith.constant 0 : index
      %c0_22 = arith.constant 0 : index
      %21 = vector.load %arg12[%c0_21, %c0_22] : memref<8x256xf32, #tpu.memory_space<vmem>>, vector<8x256xf32>
      tpu.vector_store %arg12[%c0_21, %c0_22], %20 {strides = array<i32>} : memref<8x256xf32, #tpu.memory_space<vmem>>, vector<8x256xf32>,
    } else {
    }
    %c0 = arith.constant 0 : index
    %c0_1 = arith.constant 0 : index
    %3 = vector.load %arg11[%c0, %c0_1] : memref<8x256xf32, #tpu.memory_space<vmem>>, vector<8x256xf32>
    %c0_2 = arith.constant 0 : index
    %c0_3 = arith.constant 0 : index
    %c0_4 = arith.constant 0 : index
    %4 = vector.load %arg2[%c0_2, %c0_3, %c0_4] : memref<8x48x256xbf16, #tpu.memory_space<vmem>>, vector<8x48x256xbf16>
    %5 = arith.extf %4 : vector<8x48x256xbf16> to vector<8x48x256xf32>
    %cst = arith.constant dense<0.000000e+00> : vector<8x256xf32>
    %6 = vector.multi_reduction <add>, %5, %cst [1] : vector<8x48x256xf32> to vector<8x256xf32>
    %7 = arith.addf %3, %6 : vector<8x256xf32>
    %c0_5 = arith.constant 0 : index
    %c0_6 = arith.constant 0 : index
    %8 = vector.load %arg11[%c0_5, %c0_6] : memref<8x256xf32, #tpu.memory_space<vmem>>, vector<8x256xf32>
    tpu.vector_store %arg11[%c0_5, %c0_6], %7 {strides = array<i32>} : memref<8x256xf32, #tpu.memory_space<vmem>>, vector<8x256xf32>,
    %c0_7 = arith.constant 0 : index
    %c0_8 = arith.constant 0 : index
    %9 = vector.load %arg12[%c0_7, %c0_8] : memref<8x256xf32, #tpu.memory_space<vmem>>, vector<8x256xf32>
    %c0_9 = arith.constant 0 : index
    %c0_10 = arith.constant 0 : index
    %c0_11 = arith.constant 0 : index
    %10 = vector.load %arg3[%c0_9, %c0_10, %c0_11] : memref<8x48x256xbf16, #tpu.memory_space<vmem>>, vector<8x48x256xbf16>
    %11 = arith.extf %10 : vector<8x48x256xbf16> to vector<8x48x256xf32>
    %cst_12 = arith.constant dense<0.000000e+00> : vector<8x256xf32>
    %12 = vector.multi_reduction <add>, %11, %cst_12 [1] : vector<8x48x256xf32> to vector<8x256xf32>
    %13 = arith.addf %9, %12 : vector<8x256xf32>
    %c0_13 = arith.constant 0 : index
    %c0_14 = arith.constant 0 : index
    %14 = vector.load %arg12[%c0_13, %c0_14] : memref<8x256xf32, #tpu.memory_space<vmem>>, vector<8x256xf32>
    tpu.vector_store %arg12[%c0_13, %c0_14], %13 {strides = array<i32>} : memref<8x256xf32, #tpu.memory_space<vmem>>, vector<8x256xf32>,
    %c0_i32_15 = arith.constant 0 : i32
    %15 = arith.cmpi eq, %arg1, %c0_i32_15 : i32
    %16 = arith.extui %15 : i1 to i32
    %c0_i32_16 = arith.constant 0 : i32
    %17 = arith.cmpi ne, %16, %c0_i32_16 : i32
    scf.if %17 {
      %c0_17 = arith.constant 0 : index
      %c0_18 = arith.constant 0 : index
      %18 = vector.load %arg4[%c0_17, %c0_18] : memref<8x1xf32, #tpu.memory_space<vmem>>, vector<8x1xf32>
      %19 = tpu.reciprocal %18 {approx = true} : vector<8x1xf32> -> vector<8x1xf32>
      %c0_19 = arith.constant 0 : index
      %c0_20 = arith.constant 0 : index
      %20 = vector.load %arg11[%c0_19, %c0_20] : memref<8x256xf32, #tpu.memory_space<vmem>>, vector<8x256xf32>
      %21 = vector.broadcast %19 : vector<8x1xf32> to vector<8x256xf32>
      %22 = arith.mulf %20, %21 : vector<8x256xf32>
      %23 = arith.truncf %22 : vector<8x256xf32> to vector<8x256xbf16>
      %c0_21 = arith.constant 0 : index
      %c0_22 = arith.constant 0 : index
      %24 = vector.load %arg12[%c0_21, %c0_22] : memref<8x256xf32, #tpu.memory_space<vmem>>, vector<8x256xf32>
      %25 = vector.broadcast %19 : vector<8x1xf32> to vector<8x256xf32>
      %26 = arith.mulf %24, %25 : vector<8x256xf32>
      %27 = arith.truncf %26 : vector<8x256xf32> to vector<8x256xbf16>
      %c0_23 = arith.constant 0 : index
      %c0_24 = arith.constant 0 : index
      %28 = vector.load %arg5[%c0_23, %c0_24] : memref<256x128xbf16, #tpu.memory_space<vmem>>, vector<256x128xbf16>
      %cst_25 = arith.constant dense<0.000000e+00> : vector<8x128xf32>
      %29 = tpu.matmul %23, %28, %cst_25 {dimension_numbers = #tpu.dot_dimension_numbers<[1], [0], [0], [1], [0, 0, 1, 1], [], []>} : vector<8x256xbf16>, vector<256x128xbf16>, vector<8x128xf32> -> vector<8x128xf32>
      %c0_26 = arith.constant 0 : index
      %c0_27 = arith.constant 0 : index
      %30 = vector.load %arg6[%c0_26, %c0_27] : memref<256x128xbf16, #tpu.memory_space<vmem>>, vector<256x128xbf16>
      %cst_28 = arith.constant dense<0.000000e+00> : vector<8x128xf32>
      %31 = tpu.matmul %27, %30, %cst_28 {dimension_numbers = #tpu.dot_dimension_numbers<[1], [0], [0], [1], [0, 0, 1, 1], [], []>} : vector<8x256xbf16>, vector<256x128xbf16>, vector<8x128xf32> -> vector<8x128xf32>
      %32 = arith.addf %29, %31 : vector<8x128xf32>
      %c0_29 = arith.constant 0 : index
      %c0_30 = arith.constant 0 : index
      %33 = vector.load %arg7[%c0_29, %c0_30] : memref<1x128xf32, #tpu.memory_space<vmem>>, vector<1x128xf32>
      %34 = vector.broadcast %33 : vector<1x128xf32> to vector<8x128xf32>
      %35 = arith.addf %32, %34 : vector<8x128xf32>
      %cst_31 = arith.constant 0.000000e+00 : f32
      %36 = vector.broadcast %cst_31 : f32 to vector<8x128xf32>
      %37 = arith.maximumf %35, %36 : vector<8x128xf32>
      %38 = arith.truncf %37 : vector<8x128xf32> to vector<8x128xbf16>
      %c0_32 = arith.constant 0 : index
      %c0_33 = arith.constant 0 : index
      %39 = vector.load %arg8[%c0_32, %c0_33] : memref<128x16xbf16, #tpu.memory_space<vmem>>, vector<128x16xbf16>
      %cst_34 = arith.constant dense<0.000000e+00> : vector<8x16xf32>
      %40 = tpu.matmul %38, %39, %cst_34 {dimension_numbers = #tpu.dot_dimension_numbers<[1], [0], [0], [1], [0, 0, 1, 1], [], []>} : vector<8x128xbf16>, vector<128x16xbf16>, vector<8x16xf32> -> vector<8x16xf32>
      %c0_35 = arith.constant 0 : index
      %c0_36 = arith.constant 0 : index
      %41 = vector.load %arg9[%c0_35, %c0_36] : memref<1x16xf32, #tpu.memory_space<vmem>>, vector<1x16xf32>
      %42 = vector.broadcast %41 : vector<1x16xf32> to vector<8x16xf32>
      %43 = arith.addf %40, %42 : vector<8x16xf32>
      %c0_37 = arith.constant 0 : index
      %c0_38 = arith.constant 0 : index
      %44 = vector.load %arg10[%c0_37, %c0_38] : memref<8x16xf32, #tpu.memory_space<vmem>>, vector<8x16xf32>
      tpu.vector_store %arg10[%c0_37, %c0_38], %43 {strides = array<i32>} : memref<8x16xf32, #tpu.memory_space<vmem>>, vector<8x16xf32>,
    } else {
    }
    return
  }
  func.func @transform_0(%arg0: i32, %arg1: i32) -> (i32, i32, i32) {
    %c0_i32 = arith.constant 0 : i32
    %c0_i32_0 = arith.constant 0 : i32
    return %arg0, %arg1, %c0_i32 : i32, i32, i32
  }
  func.func @transform_1(%arg0: i32, %arg1: i32) -> (i32, i32, i32) {
    %c0_i32 = arith.constant 0 : i32
    %c0_i32_0 = arith.constant 0 : i32
    return %arg0, %arg1, %c0_i32 : i32, i32, i32
  }
  func.func @transform_2(%arg0: i32, %arg1: i32) -> (i32, i32) {
    %c0_i32 = arith.constant 0 : i32
    %c0_i32_0 = arith.constant 0 : i32
    return %arg0, %c0_i32 : i32, i32
  }
  func.func @transform_3(%arg0: i32, %arg1: i32) -> (i32, i32) {
    %c0_i32 = arith.constant 0 : i32
    %c0_i32_0 = arith.constant 0 : i32
    %c0_i32_1 = arith.constant 0 : i32
    return %c0_i32, %c0_i32_0 : i32, i32
  }
  func.func @transform_4(%arg0: i32, %arg1: i32) -> (i32, i32) {
    %c0_i32 = arith.constant 0 : i32
    %c0_i32_0 = arith.constant 0 : i32
    %c0_i32_1 = arith.constant 0 : i32
    return %c0_i32, %c0_i32_0 : i32, i32
  }
  func.func @transform_5(%arg0: i32, %arg1: i32) -> (i32, i32) {
    %c0_i32 = arith.constant 0 : i32
    %c0_i32_0 = arith.constant 0 : i32
    %c0_i32_1 = arith.constant 0 : i32
    return %c0_i32, %c0_i32_0 : i32, i32
  }
  func.func @transform_6(%arg0: i32, %arg1: i32) -> (i32, i32) {
    %c0_i32 = arith.constant 0 : i32
    %c0_i32_0 = arith.constant 0 : i32
    %c0_i32_1 = arith.constant 0 : i32
    return %c0_i32, %c0_i32_0 : i32, i32
  }
  func.func @transform_7(%arg0: i32, %arg1: i32) -> (i32, i32) {
    %c0_i32 = arith.constant 0 : i32
    %c0_i32_0 = arith.constant 0 : i32
    %c0_i32_1 = arith.constant 0 : i32
    return %c0_i32, %c0_i32_0 : i32, i32
  }
  func.func @transform_8(%arg0: i32, %arg1: i32) -> (i32, i32) {
    %c0_i32 = arith.constant 0 : i32
    %c0_i32_0 = arith.constant 0 : i32
    return %arg0, %c0_i32 : i32, i32
  }
}

</mosaic_0001>

<bundles_post_ra>
// kernel: elmo_dan_forward.1
= control target key start
LH: loop header
LB: loop body
LE: loop exit
PB: predicated region body
PF: predicated region fallthrough
CT: control target
= control target key end

     0   :  { %13 = vsyncpa [#allocation5], 0  ;;  %s3087_s0 = inlined_call_operand.vmem [shape: bf16[16,48,256], index: 0, kind: input, shape index: {}]   ;;  %s3088_s1 = inlined_call_operand.vmem [shape: bf16[16,48,256], index: 1, kind: input, shape index: {}]   ;;  %s3089_s2 = inlined_call_operand.vmem [shape: f32[16,1], index: 2, kind: input, shape index: {}]   ;;  %s3090_s3 = inlined_call_operand.vmem [shape: bf16[256,128], index: 3, kind: input, shape index: {}]   ;;  %s3091_s4 = inlined_call_operand.vmem [shape: bf16[256,128], index: 4, kind: input, shape index: {}]   ;;  %s3092_s5 = inlined_call_operand.vmem [shape: f32[1,128], index: 5, kind: input, shape index: {}]   ;;  %s3093_s6 = inlined_call_operand.vmem [shape: bf16[128,16], index: 6, kind: input, shape index: {}]   ;;  %s3094_s7 = inlined_call_operand.vmem [shape: f32[1,16], index: 7, kind: input, shape index: {}]   ;;  %s3095_s8 = inlined_call_operand.hbm [shape: f32[16,16], index: 8, kind: output, shape index: {}]  }
   0x1   :  { %15 = vsyncpa [#allocation5 + $0x1], 0  ;;  %s2142_s27 = smov 0   ;;  %s2144_s28 = smov 0  }
   0x2   :  { %s2146_s29 = smov 0   ;;  %s2148_s30 = smov 0  }
   0x3   :  { %s2150_s9 = smov 0   ;;  %s2152_s10 = smov 0  }
   0x4 LB: > { %s1737_s11 = sadd.s32 4294967295, %s2091_s10   ;;  %s1738_s12 = sadd.s32 4294967294, %s2091_s10   ;;  %s2091_s10 = sphi %s2152_s10, %s21_s10   ;;  %s2087_s9 = sphi %s2150_s9, %s3302_s9   ;;  %s2083_s30 = sphi %s2148_s30, %s3301_s30   ;;  %s2079_s29 = sphi %s2146_s29, %s3300_s29   ;;  %s2075_s28 = sphi %s2144_s28, %s3299_s28   ;;  %s2071_s27 = sphi %s2142_s27, %s3298_s27  }
   0x5   : > { %s33_s13 = sadd.s32 1, %s2087_s9  ;;  %s227_s14 = sadd.s32 1, %s2079_s29 }
   0x6   : > { %p35_p0 = scmp.ge.s32.totalorder %s33_s13, 2  ;;  %p237_p1 = scmp.ne.s32.totalorder %s2079_s29, %s2075_s28 }
   0x7   : > { %p238_p2 = scmp.eq.s32.totalorder %s1737_s11, 1  ;;  %p243_p3 = scmp.ne.s32.totalorder %s2075_s28, %s2071_s27 }
   0x8   : > { %s3304_s13 = smov (%p35_p0, %s33_s13), 0  ;;  %p244_p5 = scmp.eq.s32.totalorder %s1738_s12, 1 }
   0x9   : > { %p2182_p4 = por %p238_p2, %p237_p1  ;;  %s224_s16 = ssub.s32 %s2087_s9, %s3304_s13 }
   0xa   : > { %p1741_p6 = scmp.ge.s32.totalorder %s2091_s10, 1  ;;  %p225_p7 = scmp.eq.s32.totalorder %s224_s16, 0 }
   0xb   : > { %p2189_p8 = por %p244_p5, %p243_p3  ;;  %p316_p9 = scmp.lt.s32.totalorder %s2091_s10, 3 }
   0xc   : > { %s2195_s18 = scalar_select %p225_p7, %s2079_s29, %s227_s14  }
   0xd   : > { %p317_p10 = pnand %p1741_p6, %p316_p9 }
   0xf   : > { %320 = sbr.rel (%p317_p10) target bundleno = 657 (0x291), region = 52 }
  0x16   : > { %p397_p11 = scmp.lt.s32.totalorder %s2083_s30, 1  ;;  %v2093_v0 = vmov 0   ;;  %v1927_v1 = vld [vmem:[%s3091_s4 + $0x40] sm:$0xff]   ;;  %v1931_v5 = vld [vmem:[%s3091_s4 + $0x48] sm:$0xff]   ;;  %v1935_v10 = vld [vmem:[%s3091_s4 + $0x50] sm:$0xff]   ;;  %s1743_s20 = sshll.u32 %s2083_s30, 3 }
  0x17   : > { %1926 = vset.pattern.permute.xlu0 %v2093_v0  ;;  %v1928_v2 = vld [vmem:[%s3090_s3 + $0x40] sm:$0xff]   ;;  %1794 = vmatprep.subr.bf16.mxu0 %v1927_v1  ;;  %v1932_v7 = vld [vmem:[%s3090_s3 + $0x48] sm:$0xff]   ;;  %v1936_v11 = vld [vmem:[%s3090_s3 + $0x50] sm:$0xff]   ;;  %p373_p12 = scmp.lt.s32.totalorder %s1743_s20, 15  ;;  %vm748_vm0 = vcmask 1041409   ;;  %vm750_vm1 = vcmask 1042434  }
  0x18   : > { %s398_s21 = scalar_select %p397_p11, %s2083_s30, 1  ;;  %v1929_v3 = vld [vmem:[%s3091_s4] sm:$0xff]   ;;  %1816 = vmatprep.subr.bf16.mxu1 %v1928_v2  ;;  %v1933_v8 = vld [vmem:[%s3091_s4 + $0x8] sm:$0xff]   ;;  %v1937_v12 = vld [vmem:[%s3091_s4 + $0x10] sm:$0xff]   ;;  %vm752_vm2 = vcmask 1043459   ;;  %vm754_vm3 = vcmask 1044484  }
  0x19   : > { %v1930_v4 = vld [vmem:[%s3090_s3] sm:$0xff]   ;;  %1795 = vmatpush3.bf16.msra.mxu0 %v1929_v3  ;;  %v1934_v9 = vld [vmem:[%s3090_s3 + $0x8] sm:$0xff]   ;;  %v1938_v13 = vld [vmem:[%s3090_s3 + $0x10] sm:$0xff]   ;;  %s3306_s20 = smov (!%p373_p12, %s1743_s20), 15  ;;  %vm756_vm4 = vcmask 1045509   ;;  %vm758_vm5 = vcmask 1046534  }
  0x1a   : > { %s1747_s26 = sshll.u32 %s398_s21, 3  ;;  %1817 = vmatpush3.bf16.msra.mxu1 %v1930_v4  ;;  %1796 = vmatprep.subr.bf16.mxu0 %v1931_v5  ;;  %v1939_v14 = vld [vmem:[%s3091_s4 + $0x58] sm:$0xff]   ;;  %v1943_v19 = vld [vmem:[%s3091_s4 + $0x60] sm:$0xff]   ;;  %v1947_v23 = vld [vmem:[%s3091_s4 + $0x68] sm:$0xff]   ;;  %s1867_s22 = smul.u32 48, %s3306_s20  ;;  %vm760_vm6 = vcmask 1047559  }
  0x1b   : > { %s400_s19 = scalar_lea.vmem %s3089_s2, %s1747_s26  ;;  %1818 = vmatprep.subr.bf16.mxu1 %v1932_v7  ;;  %v1940_v15 = vld [vmem:[%s3090_s3 + $0x58] sm:$0xff]   ;;  %v1944_v20 = vld [vmem:[%s3090_s3 + $0x60] sm:$0xff]   ;;  %v1948_v24 = vld [vmem:[%s3090_s3 + $0x68] sm:$0xff]   ;;  %vm2095_vm7 = vmmov 0   ;;  %s368_s24 = sand.u32 1, %s2075_s28   ;;  %vm1612_vm8 = vcmask 130048  }
  0x1c   : > { %v1136_v6 = vld [vmem:[%s400_s19] sm:$0xff]  ;;  %v1941_v16 = vld [vmem:[%s3091_s4 + $0x18] sm:$0xff]   ;;  %v1949_v25 = vld [vmem:[%s3091_s4 + $0x28] sm:$0xff]   ;;  %s2286_s23 = scalar_lea.vmem %s3087_s0, %s1867_s22  ;;  %s2457_s19 = scalar_lea.vmem %s3088_s1, %s1867_s22 }
  0x1d   : > { %1967 = vrcp.f32 %v1136_v6  ;;  %1797 = vmatpush3.bf16.msra.mxu0 %v1933_v8  ;;  %v1942_v17 = vld [vmem:[%s3090_s3 + $0x18] sm:$0xff]   ;;  %v1945_v21 = vld [vmem:[%s3091_s4 + $0x20] sm:$0xff]   ;;  %v1950_v26 = vld [vmem:[%s3090_s3 + $0x28] sm:$0xff]   ;;  %s1742_s21 = sshll.u32 %s368_s24, 3  ;;  %s1791_s26 = sshll.u32 %s2083_s30, 7 }
  0x1e   : > { %1819 = vmatpush3.bf16.msra.mxu1 %v1934_v9  ;;  %1798 = vmatprep.subr.bf16.mxu0 %v1935_v10  ;;  %v1946_v22 = vld [vmem:[%s3090_s3 + $0x20] sm:$0xff]   ;;  %v1951_v27 = vld [vmem:[%s3091_s4 + $0x70] sm:$0xff]   ;;  %v2301_v32 = vld [vmem:[%s2286_s23 + $0x8] sm:$0xff]  ;;  %s370_s12 = scalar_lea.vmem [#allocation4], %s1742_s21  ;;  %s1615_s30 = scalar_lea.sflag [#allocation5], %s368_s24 }
  0x1f   : > { %1820 = vmatprep.subr.bf16.mxu1 %v1936_v11  ;;  %v1952_v28 = vld [vmem:[%s3090_s3 + $0x70] sm:$0xff]   ;;  %v2298_v31 = vld [vmem:[%s2286_s23] sm:$0xff]  ;;  %3143 = vst [vmem:[#allocation8_spill] sm:$0xff] %v2301_v32  ;;  %v2307_v34 = vld [vmem:[%s2286_s23 + $0x18] sm:$0xff]  ;;  %v462_v39 = vunpack.c.l.bf16 %v2301_v32  ;;  %s2096_s22 = smov [#allocation4]  }
  0x20   : > { %v1953_v29 = vld [vmem:[%s3091_s4 + $0x30] sm:$0xff]   ;;  %3142 = vst [vmem:[#allocation7_spill] sm:$0xff] %v2298_v31  ;;  %3145 = vst [vmem:[#allocation10_spill] sm:$0xff] %v2307_v34  ;;  %v460_v35 = vunpack.c.l.bf16 %v2298_v31  ;;  %v416_v36 = vld [vmem:[%s2286_s23 + $0x20] sm:$0xff]  ;;  %v466_v44 = vunpack.c.l.bf16 %v2307_v34  ;;  %s2017_s21 = sshll.u32 %s2096_s22, 4  ;;  %s2018_s21 = int_to_ptr.vmem [resolvable:$false] %s2017_s21 }
  0x21   : > { %1799 = vmatpush3.bf16.msra.mxu0 %v1937_v12  ;;  %v1954_v30 = vld [vmem:[%s3090_s3 + $0x30] sm:$0xff]   ;;  %v2312_v37 = vld [vmem:[%s2286_s23 + $0x28] sm:$0xff]  ;;  %v419_v41 = vld [vmem:[%s2286_s23 + $0x38] sm:$0xff]  ;;  %v468_v45 = vunpack.c.l.bf16 %v416_v36  ;;  %s2019_s25 = scalar_lea.vmem %s2018_s21, 256 }
  0x22   : > { %1821 = vmatpush3.bf16.msra.mxu1 %v1938_v13  ;;  %1800 = vmatprep.subr.bf16.mxu0 %v1939_v14  ;;  %v2304_v33 = vld [vmem:[%s2286_s23 + $0x10] sm:$0xff]  ;;  %v420_v42 = vld [vmem:[%s2286_s23 + $0x40] sm:$0xff]  ;;  %v421_v43 = vld [vmem:[%s2286_s23 + $0x48] sm:$0xff]  ;;  %v470_v51 = vunpack.c.l.bf16 %v2312_v37  ;;  %v474_v52 = vunpack.c.l.bf16 %v419_v41  ;;  %v556_v54 = vadd.f32 %v462_v39, %v460_v35 }
  0x23   : > { %1822 = vmatprep.subr.bf16.mxu1 %v1940_v15  ;;  %3144 = vst [vmem:[#allocation9_spill] sm:$0xff] %v2304_v33  ;;  %v418_v38 = vld [vmem:[%s2286_s23 + $0x30] sm:$0xff]  ;;  %v464_v40 = vunpack.c.l.bf16 %v2304_v33  ;;  %v2326_v49 = vld [vmem:[%s2286_s23 + $0x58] sm:$0xff]  ;;  %v2329_v50 = vld [vmem:[%s2286_s23 + $0x60] sm:$0xff]  ;;  %v476_v53 = vunpack.c.l.bf16 %v420_v42  ;;  %v478_v58 = vunpack.c.l.bf16 %v421_v43 }
  0x24   : > { %v472_v46 = vunpack.c.l.bf16 %v418_v38  ;;  %v2323_v48 = vld [vmem:[%s2286_s23 + $0x50] sm:$0xff]  ;;  %v2333_v55 = vld [vmem:[%s2286_s23 + $0x68] sm:$0xff]  ;;  %v2339_v57 = vld [vmem:[%s2286_s23 + $0x78] sm:$0xff]  ;;  %v482_v60 = vunpack.c.l.bf16 %v2326_v49  ;;  %v484_v61 = vunpack.c.l.bf16 %v2329_v50 }
  0x25   : > { %1801 = vmatpush3.bf16.msra.mxu0 %v1941_v16  ;;  %v2336_v56 = vld [vmem:[%s2286_s23 + $0x70] sm:$0xff]  ;;  %v480_v59 = vunpack.c.l.bf16 %v2323_v48  ;;  %v2345_v62 = vld [vmem:[%s2286_s23 + $0x80] sm:$0xff]  ;;  %v2348_v63 = vld [vmem:[%s2286_s23 + $0x88] sm:$0xff]  ;;  %v486_v1 = vunpack.c.l.bf16 %v2333_v55  ;;  %v490_v3 = vunpack.c.l.bf16 %v2339_v57  ;;  %v557_v4 = vadd.f32 %v556_v54, %v464_v40 }
  0x26   : > { %1823 = vmatpush3.bf16.msra.mxu1 %v1942_v17  ;;  %1802 = vmatprep.subr.bf16.mxu0 %v1943_v19  ;;  %v2351_v0 = vld [vmem:[%s2286_s23 + $0x90] sm:$0xff]  ;;  %v488_v2 = vunpack.c.l.bf16 %v2336_v56  ;;  %v2357_v5 = vld [vmem:[%s2286_s23 + $0x98] sm:$0xff]  ;;  %v2360_v6 = vld [vmem:[%s2286_s23 + $0xa0] sm:$0xff]  ;;  %v578_v11 = vadd.f32 %v474_v52, %v472_v46 }
  0x27   : > { %v1968_v18 = vpop.eup %1967  ;;  %1824 = vmatprep.subr.bf16.mxu1 %v1944_v20  ;;  %v2363_v7 = vld [vmem:[%s2286_s23 + $0xa8] sm:$0xff]  ;;  %v496_v10 = vunpack.c.l.bf16 %v2351_v0  ;;  %v2369_v12 = vld [vmem:[%s2286_s23 + $0xb0] sm:$0xff]  ;;  %v2372_v13 = vld [vmem:[%s2286_s23 + $0xb8] sm:$0xff]  ;;  %v498_v15 = vunpack.c.l.bf16 %v2357_v5  ;;  %v500_v16 = vunpack.c.l.bf16 %v2360_v6 }
  0x28   : > { %1142 = vperm.xlu0 %1926, %v1968_v18   ;;  %v2375_v14 = vld [vmem:[%s2286_s23 + $0xc0] sm:$0xff]  ;;  %v558_v18 = vadd.f32 %v557_v4, %v466_v44  ;;  %v437_v19 = vld [vmem:[%s2286_s23 + $0xc8] sm:$0xff]  ;;  %v2382_v20 = vld [vmem:[%s2286_s23 + $0xd0] sm:$0xff]  ;;  %v3146_v56 = vunpack.c.l.bf16 %v2363_v7  ;;  %v3149_v57 = vunpack.c.l.bf16 %v2369_v12 }
  0x29   : > { %1803 = vmatpush3.bf16.msra.mxu0 %v1945_v21  ;;  %v2385_v21 = vld [vmem:[%s2286_s23 + $0xd8] sm:$0xff]  ;;  %v444_v38 = vld [vmem:[%s2286_s23 + $0x100] sm:$0xff]  ;;  %v2402_v39 = vld [vmem:[%s2286_s23 + $0x108] sm:$0xff]  ;;  %v622_v49 = vadd.f32 %v498_v15, %v496_v10 }
  0x2a   : > { %1825 = vmatpush3.bf16.msra.mxu1 %v1946_v22  ;;  %1804 = vmatprep.subr.bf16.mxu0 %v1947_v23  ;;  %v559_v36 = vadd.f32 %v558_v18, %v468_v45  ;;  %v443_v37 = vld [vmem:[%s2286_s23 + $0xf8] sm:$0xff]  ;;  %v2407_v44 = vld [vmem:[%s2286_s23 + $0x110] sm:$0xff]  ;;  %v448_v45 = vld [vmem:[%s2286_s23 + $0x120] sm:$0xff]  ;;  %v524_v52 = vunpack.c.l.bf16 %v444_v38 }
  0x2b   : > { %1826 = vmatprep.subr.bf16.mxu1 %v1948_v24  ;;  %v508_v24 = vunpack.c.l.bf16 %v2375_v14  ;;  %v2410_v46 = vld [vmem:[%s2286_s23 + $0x118] sm:$0xff]  ;;  %v522_v48 = vunpack.c.l.bf16 %v443_v37  ;;  %v449_v4 = vld [vmem:[%s2286_s23 + $0x128] sm:$0xff]  ;;  %v454_v37 = vld [vmem:[%s2286_s23 + $0x150] sm:$0xff]  ;;  %v623_v50 = vadd.f32 %v622_v49, %v500_v16  ;;  %v3148_v16 = vunpack.c.l.bf16 %v2345_v62 }
  0x2c   : > { %v560_v54 = vadd.f32 %v559_v36, %v470_v51  ;;  %v451_v14 = vld [vmem:[%s2286_s23 + $0x138] sm:$0xff]  ;;  %v534_v38 = vunpack.c.l.bf16 %v449_v4  ;;  %v456_v41 = vld [vmem:[%s2286_s23 + $0x160] sm:$0xff]  ;;  %v457_v23 = vld [vmem:[%s2286_s23 + $0x168] sm:$0xff]  ;;  %v544_v40 = vunpack.c.l.bf16 %v454_v37 }
  0x2d   : > { %1805 = vmatpush3.bf16.msra.mxu0 %v1949_v25  ;;  %v579_v25 = vadd.f32 %v578_v11, %v476_v53  ;;  %v526_v53 = vunpack.c.l.bf16 %v2402_v39  ;;  %v450_v11 = vld [vmem:[%s2286_s23 + $0x130] sm:$0xff]  ;;  %v538_v51 = vunpack.c.l.bf16 %v451_v14  ;;  %v455_v47 = vld [vmem:[%s2286_s23 + $0x158] sm:$0xff]  ;;  %v548_v22 = vunpack.c.l.bf16 %v456_v41  ;;  %v2662_v32 = vld [vmem:[%s2457_s19 + $0x160] sm:$0xff] }
  0x2e   : > { %1827 = vmatpush3.bf16.msra.mxu1 %v1950_v26  ;;  %1806 = vmatprep.subr.bf16.mxu0 %v1951_v27  ;;  %v2391_v26 = vld [vmem:[%s2286_s23 + $0xe0] sm:$0xff]  ;;  %v2394_v27 = vld [vmem:[%s2286_s23 + $0xe8] sm:$0xff]  ;;  %v536_v39 = vunpack.c.l.bf16 %v450_v11  ;;  %v561_v36 = vrot.slane %v560_v54, 4  ;;  %v546_v18 = vunpack.c.l.bf16 %v455_v47  ;;  %v550_v8 = vunpack.c.l.bf16 %v457_v23  ;;  %3195 = vst [vmem:[#allocation51_spill] sm:$0xff] %v2662_v32 }
  0x2f   : > { %1828 = vmatprep.subr.bf16.mxu1 %v1952_v28  ;;  %v442_v28 = vld [vmem:[%s2286_s23 + $0xf0] sm:$0xff]  ;;  %v580_v43 = vadd.f32 %v579_v25, %v478_v58  ;;  %v528_v58 = vunpack.c.l.bf16 %v2407_v44  ;;  %v452_v25 = vld [vmem:[%s2286_s23 + $0x140] sm:$0xff]  ;;  %v3150_v7 = vunpack.c.l.bf16 %v2391_v26  ;;  %v3153_v12 = vunpack.c.l.bf16 %v2394_v27  ;;  %v2477_v27 = vld [vmem:[%s2457_s19 + $0x8] sm:$0xff] }
  0x30   : > { %v520_v42 = vunpack.c.l.bf16 %v442_v28  ;;  %v2421_v28 = vld [vmem:[%s2286_s23 + $0x148] sm:$0xff]  ;;  %v540_v9 = vunpack.c.l.bf16 %v452_v25  ;;  %v562_v35 = vadd.f32 %v561_v36, %v560_v54  ;;  %v600_v25 = vadd.f32 %v486_v1, %v484_v61  ;;  %3156 = vst [vmem:[#allocation12_spill] sm:$0xff] %v2477_v27 }
  0x31   : > { %1807 = vmatpush3.bf16.msra.mxu0 %v1953_v29  ;;  %v510_v29 = vunpack.c.l.bf16 %v437_v19  ;;  %v532_v19 = vunpack.c.l.bf16 %v448_v45  ;;  %v542_v44 = vunpack.c.l.bf16 %v2421_v28  ;;  %v710_v54 = vadd.f32 %v546_v18, %v544_v40  ;;  %v2665_v31 = vld [vmem:[%s2457_s19 + $0x168] sm:$0xff] }
  0x32   : > { %1829 = vmatpush3.bf16.msra.mxu1 %v1954_v30  ;;  %v512_v30 = vunpack.c.l.bf16 %v2382_v20  ;;  %v581_v20 = vadd.f32 %v580_v43, %v480_v59  ;;  %v458_v59 = vld [vmem:[%s2286_s23 + $0x170] sm:$0xff]  ;;  %v459_v43 = vld [vmem:[%s2286_s23 + $0x178] sm:$0xff]  ;;  %v563_v17 = vrot.slane %v562_v35, 2  ;;  %v601_v23 = vadd.f32 %v600_v25, %v488_v2  ;;  %3196 = vst [vmem:[#allocation52_spill] sm:$0xff] %v2665_v31 }
  0x33   : > { %v552_v4 = vunpack.c.l.bf16 %v458_v59  ;;  %v554_v11 = vunpack.c.l.bf16 %v459_v43  ;;  %v688_v41 = vadd.f32 %v534_v38, %v532_v19  ;;  %v711_v10 = vadd.f32 %v710_v54, %v548_v22  ;;  %v2485_v54 = vld [vmem:[%s2457_s19 + $0x18] sm:$0xff]  ;;  %v2628_v25 = vld [vmem:[%s2457_s19 + $0x130] sm:$0xff] }
  0x34   : > { %v582_v45 = vadd.f32 %v581_v20, %v482_v60  ;;  %v644_v60 = vadd.f32 %v510_v29, %v508_v24  ;;  %v666_v20 = vadd.f32 %v522_v48, %v520_v42  ;;  %v564_v28 = vadd.f32 %v563_v17, %v562_v35  ;;  %3189 = vst [vmem:[#allocation45_spill] sm:$0xff] %v2628_v25 }
  0x35   : > { %v602_v1 = vadd.f32 %v601_v23, %v490_v3  ;;  %v689_v5 = vadd.f32 %v688_v41, %v536_v39  ;;  %v624_v2 = vadd.f32 %v623_v50, %v3146_v56  ;;  %v3147_v24 = vunpack.c.l.bf16 %v2385_v21  ;;  %v2649_v50 = vld [vmem:[%s2457_s19 + $0x148] sm:$0xff] }
  0x36   : > { %v583_v14 = vrot.slane %v582_v45, 4  ;;  %v645_v55 = vadd.f32 %v644_v60, %v512_v30  ;;  %v667_v61 = vadd.f32 %v666_v20, %v524_v52  ;;  %v565_v15 = vrot.slane %v564_v28, 1  ;;  %v2481_v60 = vld [vmem:[%s2457_s19 + $0x10] sm:$0xff]  ;;  %3192 = vst [vmem:[#allocation48_spill] sm:$0xff] %v2649_v50 }
  0x37   : > { %v603_v30 = vadd.f32 %v602_v1, %v3148_v16  ;;  %v690_v35 = vadd.f32 %v689_v5, %v538_v51  ;;  %v712_v40 = vadd.f32 %v711_v10, %v550_v8  ;;  %v625_v3 = vadd.f32 %v624_v2, %v3149_v57  ;;  %v2493_v5 = vld [vmem:[%s2457_s19 + $0x28] sm:$0xff]  ;;  %v2496_v10 = vld [vmem:[%s2457_s19 + $0x30] sm:$0xff] }
  0x38   : > { %v584_v47 = vadd.f32 %v583_v14, %v582_v45  ;;  %v646_v17 = vadd.f32 %v645_v55, %v3147_v24  ;;  %v668_v29 = vadd.f32 %v667_v61, %v526_v53  ;;  %v3151_v48 = vunpack.c.l.bf16 %v2348_v63  ;;  %v2474_v63 = vld [vmem:[%s2457_s19] sm:$0xff]  ;;  %3157 = vst [vmem:[#allocation13_spill] sm:$0xff] %v2493_v5  ;;  %3158 = vst [vmem:[#allocation14_spill] sm:$0xff] %v2496_v10  ;;  %v2512_v57 = vld [vmem:[%s2457_s19 + $0x50] sm:$0xff] }
  0x39   : > { %v691_v52 = vadd.f32 %v690_v35, %v540_v9  ;;  %v713_v53 = vadd.f32 %v712_v40, %v552_v4  ;;  %v3152_v18 = vunpack.c.l.bf16 %v2372_v13  ;;  %v3154_v26 = vunpack.c.l.bf16 %v2410_v46  ;;  %3155 = vst [vmem:[#allocation11_spill] sm:$0xff] %v2474_v63  ;;  %v2509_v40 = vld [vmem:[%s2457_s19 + $0x48] sm:$0xff]  ;;  %v2652_v20 = vld [vmem:[%s2457_s19 + $0x150] sm:$0xff] }
  0x3a   : > { %v585_v0 = vrot.slane %v584_v47, 2  ;;  %v647_v21 = vadd.f32 %v646_v17, %v3150_v7  ;;  %v669_v22 = vadd.f32 %v668_v29, %v528_v58  ;;  %v604_v8 = vadd.f32 %v603_v30, %v3151_v48  ;;  %v2502_v17 = vld [vmem:[%s2457_s19 + $0x38] sm:$0xff]  ;;  %v2505_v29 = vld [vmem:[%s2457_s19 + $0x40] sm:$0xff]  ;;  %3193 = vst [vmem:[#allocation49_spill] sm:$0xff] %v2652_v20 }
  0x3b   : > { %v626_v19 = vadd.f32 %v625_v3, %v3152_v18  ;;  %v566_v39 = vadd.f32 %v565_v15, %v564_v28  ;;  %v692_v36 = vadd.f32 %v691_v52, %v542_v44  ;;  %v714_v45 = vadd.f32 %v713_v53, %v554_v11  ;;  %v2488_v28 = vld [vmem:[%s2457_s19 + $0x20] sm:$0xff]  ;;  %v1955_v15 = vld [vmem:[%s3091_s4 + $0x78] sm:$0xff]   ;;  %3159 = vst [vmem:[#allocation15_spill] sm:$0xff] %v2502_v17 }
  0x3c   : > { %v586_v6 = vadd.f32 %v585_v0, %v584_v47  ;;  %v648_v37 = vadd.f32 %v647_v21, %v3153_v12  ;;  %v670_v38 = vadd.f32 %v669_v22, %v3154_v26  ;;  %v605_v51 = vrot.slane %v604_v8, 4  ;;  %1808 = vmatprep.subr.bf16.mxu0 %v1955_v15  ;;  %v1956_v7 = vld [vmem:[%s3090_s3 + $0x78] sm:$0xff]   ;;  %v2526_v12 = vld [vmem:[%s2457_s19 + $0x60] sm:$0xff]  ;;  %v2532_v26 = vld [vmem:[%s2457_s19 + $0x70] sm:$0xff] }
  0x3d   : > { %v627_v59 = vrot.slane %v626_v19, 4  ;;  %v693_v4 = vrot.slane %v692_v36, 4  ;;  %v715_v14 = vrot.slane %v714_v45, 4  ;;  %v2519_v48 = vld [vmem:[%s2457_s19 + $0x58] sm:$0xff]  ;;  %3161 = vst [vmem:[#allocation17_spill] sm:$0xff] %v2526_v12  ;;  %3163 = vst [vmem:[#allocation19_spill] sm:$0xff] %v2532_v26  ;;  %1830 = vmatprep.subr.bf16.mxu1 %v1956_v7 }
  0x3e   : > { %v587_v62 = vrot.slane %v586_v6, 1  ;;  %v649_v13 = vrot.slane %v648_v37, 4  ;;  %v671_v43 = vrot.slane %v670_v38, 4  ;;  %v606_v46 = vadd.f32 %v605_v51, %v604_v8  ;;  %3160 = vst [vmem:[#allocation16_spill] sm:$0xff] %v2519_v48  ;;  %v1957_v52 = vld [vmem:[%s3091_s4 + $0x38] sm:$0xff]   ;;  %v2572_v15 = vld [vmem:[%s2457_s19 + $0xc0] sm:$0xff] }
  0x3f   : > { %v628_v44 = vadd.f32 %v627_v59, %v626_v19  ;;  %v694_v23 = vadd.f32 %v693_v4, %v692_v36  ;;  %v716_v41 = vadd.f32 %v715_v14, %v714_v45  ;;  %v2542_v59 = vld [vmem:[%s2457_s19 + $0x80] sm:$0xff]  ;;  %1809 = vmatpush3.bf16.msra.mxu0 %v1957_v52  ;;  %3172 = vst [vmem:[#allocation28_spill] sm:$0xff] %v2572_v15  ;;  %v2588_v7 = vld [vmem:[%s2457_s19 + $0xd8] sm:$0xff]  ;;  %v2594_v52 = vld [vmem:[%s2457_s19 + $0xe8] sm:$0xff] }
  0x40   : > { %v588_v9 = vadd.f32 %v587_v62, %v586_v6  ;;  %v650_v11 = vadd.f32 %v649_v13, %v648_v37  ;;  %v672_v49 = vadd.f32 %v671_v43, %v670_v38  ;;  %v607_v47 = vrot.slane %v606_v46, 2  ;;  %v2529_v37 = vld [vmem:[%s2457_s19 + $0x68] sm:$0xff]  ;;  %v2548_v43 = vld [vmem:[%s2457_s19 + $0x90] sm:$0xff]  ;;  %3177 = vst [vmem:[#allocation33_spill] sm:$0xff] %v2588_v7  ;;  %3179 = vst [vmem:[#allocation35_spill] sm:$0xff] %v2594_v52 }
  0x41   : > { %v629_v55 = vrot.slane %v628_v44, 2  ;;  %v695_v2 = vrot.slane %v694_v23, 2  ;;  %v717_v24 = vrot.slane %v716_v41, 2  ;;  %3162 = vst [vmem:[#allocation18_spill] sm:$0xff] %v2529_v37  ;;  %v2545_v13 = vld [vmem:[%s2457_s19 + $0x88] sm:$0xff]  ;;  %3166 = vst [vmem:[#allocation22_spill] sm:$0xff] %v2548_v43  ;;  %v861_v38 = vunpack.c.l.bf16 %v2548_v43 }
  0x42   : > { %v651_v61 = vrot.slane %v650_v11, 2  ;;  %v673_v0 = vrot.slane %v672_v49, 2  ;;  %v749_v1 = vsel %vm748_vm0, %v588_v9, %v566_v39  ;;  %v608_v56 = vadd.f32 %v607_v47, %v606_v46  ;;  %v1958_v39 = vld [vmem:[%s3090_s3 + $0x38] sm:$0xff]   ;;  %3165 = vst [vmem:[#allocation21_spill] sm:$0xff] %v2545_v13  ;;  %v2561_v47 = vld [vmem:[%s2457_s19 + $0xb0] sm:$0xff]  ;;  %v2642_v6 = vld [vmem:[%s2457_s19 + $0x140] sm:$0xff] }
  0x43   : > { %v630_v16 = vadd.f32 %v629_v55, %v628_v44  ;;  %v696_v22 = vadd.f32 %v695_v2, %v694_v23  ;;  %v718_v62 = vadd.f32 %v717_v24, %v716_v41  ;;  %v2539_v9 = vld [vmem:[%s2457_s19 + $0x78] sm:$0xff]  ;;  %3170 = vst [vmem:[#allocation26_spill] sm:$0xff] %v2561_v47  ;;  %1831 = vmatpush3.bf16.msra.mxu1 %v1958_v39  ;;  %v2578_v2 = vld [vmem:[%s2457_s19 + $0xd0] sm:$0xff]  ;;  %v2610_v39 = vld [vmem:[%s2457_s19 + $0x108] sm:$0xff]  ;;  %v869_v41 = vunpack.c.l.bf16 %v2561_v47 }
  0x44   : > { %v652_v30 = vadd.f32 %v651_v61, %v650_v11  ;;  %v674_v35 = vadd.f32 %v673_v0, %v672_v49  ;;  %v609_v21 = vrot.slane %v608_v56, 1  ;;  %3164 = vst [vmem:[#allocation20_spill] sm:$0xff] %v2539_v9  ;;  %v2552_v44 = vld [vmem:[%s2457_s19 + $0x98] sm:$0xff]  ;;  %v2555_v11 = vld [vmem:[%s2457_s19 + $0xa0] sm:$0xff]  ;;  %v2558_v49 = vld [vmem:[%s2457_s19 + $0xa8] sm:$0xff]  ;;  %v855_v58 = vunpack.c.l.bf16 %v2539_v9 }
  0x45   : > { %v631_v53 = vrot.slane %v630_v16, 1  ;;  %v697_v36 = vrot.slane %v696_v22, 1  ;;  %v719_v45 = vrot.slane %v718_v62, 1  ;;  %3167 = vst [vmem:[#allocation23_spill] sm:$0xff] %v2552_v44  ;;  %3168 = vst [vmem:[#allocation24_spill] sm:$0xff] %v2555_v11  ;;  %v2569_v0 = vld [vmem:[%s2457_s19 + $0xb8] sm:$0xff]  ;;  %v863_v8 = vunpack.c.l.bf16 %v2552_v44 }
  0x46   : > { %v653_v18 = vrot.slane %v652_v30, 1  ;;  %v675_v19 = vrot.slane %v674_v35, 1  ;;  %v610_v51 = vadd.f32 %v609_v21, %v608_v56  ;;  %3169 = vst [vmem:[#allocation25_spill] sm:$0xff] %v2558_v49  ;;  %v2575_v56 = vld [vmem:[%s2457_s19 + $0xc8] sm:$0xff]  ;;  %3174 = vst [vmem:[#allocation30_spill] sm:$0xff] %v2578_v2  ;;  %v2591_v21 = vld [vmem:[%s2457_s19 + $0xe0] sm:$0xff]  ;;  %v865_v24 = vunpack.c.l.bf16 %v2555_v11 }
  0x47   : > { %v632_v4 = vadd.f32 %v631_v53, %v630_v16  ;;  %3173 = vst [vmem:[#allocation29_spill] sm:$0xff] %v2575_v56  ;;  %3178 = vst [vmem:[#allocation34_spill] sm:$0xff] %v2591_v21  ;;  %v2597_v53 = vld [vmem:[%s2457_s19 + $0xf0] sm:$0xff]  ;;  %v2635_v16 = vld [vmem:[%s2457_s19 + $0x138] sm:$0xff]  ;;  %v867_v3 = vunpack.c.l.bf16 %v2558_v49  ;;  %v875_v23 = vunpack.c.l.bf16 %v2575_v56  ;;  %v877_v46 = vunpack.c.l.bf16 %v2578_v2 }
  0x48   : > { %v654_v14 = vadd.f32 %v653_v18, %v652_v30  ;;  %v2565_v55 = vadd.f32 %v675_v19, %v674_v35  ;;  %v751_v61 = vsel %vm750_vm1, %v610_v51, %v749_v1  ;;  %v2582_v30 = vadd.f32 %v697_v36, %v696_v22  ;;  %3180 = vst [vmem:[#allocation36_spill] sm:$0xff] %v2597_v53  ;;  %v2607_v19 = vld [vmem:[%s2457_s19 + $0x100] sm:$0xff]  ;;  %v2613_v51 = vld [vmem:[%s2457_s19 + $0x110] sm:$0xff]  ;;  %v2675_v49 = vld [vmem:[%s2457_s19 + $0x178] sm:$0xff] }
  0x49   : > { %v2584_v1 = vadd.f32 %v719_v45, %v718_v62  ;;  %v753_v35 = vsel %vm752_vm2, %v632_v4, %v751_v61  ;;  %v2604_v62 = vld [vmem:[%s2457_s19 + $0xf8] sm:$0xff]  ;;  %3183 = vst [vmem:[#allocation39_spill] sm:$0xff] %v2607_v19  ;;  %3184 = vst [vmem:[#allocation40_spill] sm:$0xff] %v2610_v39  ;;  %v849_v36 = vunpack.c.l.bf16 %v2526_v12  ;;  %v851_v45 = vunpack.c.l.bf16 %v2529_v37  ;;  %v2668_v56 = vld [vmem:[%s2457_s19 + $0x170] sm:$0xff] }
  0x4a   : > { %3171 = vst [vmem:[#allocation27_spill] sm:$0xff] %v2565_v55  ;;  %3175 = vst [vmem:[#allocation31_spill] sm:$0xff] %v2582_v30  ;;  %v2601_v22 = vsel %vm754_vm3, %v654_v14, %v753_v35  ;;  %v853_v4 = vunpack.c.l.bf16 %v2532_v26  ;;  %v2619_v61 = vld [vmem:[%s2457_s19 + $0x118] sm:$0xff]  ;;  %v2622_v14 = vld [vmem:[%s2457_s19 + $0x120] sm:$0xff]  ;;  %v873_v18 = vunpack.c.l.bf16 %v2572_v15  ;;  %v879_v30 = vunpack.c.l.bf16 %v2588_v7 }
  0x4b   : > { %3176 = vst [vmem:[#allocation32_spill] sm:$0xff] %v2584_v1  ;;  %3181 = vst [vmem:[#allocation37_spill] sm:$0xff] %v2601_v22  ;;  %v2625_v35 = vld [vmem:[%s2457_s19 + $0x128] sm:$0xff]  ;;  %v2655_v1 = vld [vmem:[%s2457_s19 + $0x158] sm:$0xff]  ;;  %v881_v34 = vunpack.c.l.bf16 %v2591_v21  ;;  %v883_v33 = vunpack.c.l.bf16 %v2594_v52  ;;  %v885_v42 = vunpack.c.l.bf16 %v2597_v53  ;;  %v887_v2 = vunpack.c.l.bf16 %v2604_v62  ;;  %s3040_s19 = scalar_lea.hbm %s3095_s8, %s1791_s26 }
  0x4c   : > { %3182 = vst [vmem:[#allocation38_spill] sm:$0xff] %v2604_v62  ;;  %3185 = vst [vmem:[#allocation41_spill] sm:$0xff] %v2613_v51  ;;  %v889_v15 = vunpack.c.l.bf16 %v2607_v19  ;;  %v891_v47 = vunpack.c.l.bf16 %v2610_v39  ;;  %v893_v7 = vunpack.c.l.bf16 %v2613_v51  ;;  %v895_v52 = vunpack.c.l.bf16 %v2619_v61 }
  0x4d   : > { %3186 = vst [vmem:[#allocation42_spill] sm:$0xff] %v2619_v61  ;;  %3187 = vst [vmem:[#allocation43_spill] sm:$0xff] %v2622_v14  ;;  %v897_v53 = vunpack.c.l.bf16 %v2622_v14  ;;  %v899_v21 = vunpack.c.l.bf16 %v2625_v35  ;;  %v901_v11 = vunpack.c.l.bf16 %v2628_v25  ;;  %v903_v44 = vunpack.c.l.bf16 %v2635_v16 }
  0x4e   : > { %3188 = vst [vmem:[#allocation44_spill] sm:$0xff] %v2625_v35  ;;  %3190 = vst [vmem:[#allocation46_spill] sm:$0xff] %v2635_v16  ;;  %v905_v62 = vunpack.c.l.bf16 %v2642_v6  ;;  %v907_v19 = vunpack.c.l.bf16 %v2649_v50  ;;  %v909_v39 = vunpack.c.l.bf16 %v2652_v20  ;;  %v911_v51 = vunpack.c.l.bf16 %v2655_v1 }
  0x4f   : > { %3191 = vst [vmem:[#allocation47_spill] sm:$0xff] %v2642_v6  ;;  %3194 = vst [vmem:[#allocation50_spill] sm:$0xff] %v2655_v1  ;;  %v913_v43 = vunpack.c.l.bf16 %v2662_v32  ;;  %v915_v61 = vunpack.c.l.bf16 %v2665_v31  ;;  %v917_v14 = vunpack.c.l.bf16 %v2668_v56  ;;  %v919_v35 = vunpack.c.l.bf16 %v2675_v49 }
  0x50   : > { %3197 = vst [vmem:[#allocation53_spill] sm:$0xff] %v2668_v56  ;;  %3198 = vst [vmem:[#allocation54_spill] sm:$0xff] %v2675_v49  ;;  %v3199_v25 = vunpack.c.l.bf16 %v2474_v63  ;;  %v3200_v16 = vunpack.c.l.bf16 %v2477_v27  ;;  %v3201_v6 = vunpack.c.l.bf16 %v2496_v10  ;;  %v3202_v50 = vunpack.c.l.bf16 %v2502_v17 }
  0x51   : > { %v965_v26 = vadd.f32 %v851_v45, %v849_v36  ;;  %v987_v1 = vadd.f32 %v863_v8, %v861_v38  ;;  %v1009_v37 = vadd.f32 %v875_v23, %v873_v18  ;;  %v1031_v32 = vadd.f32 %v887_v2, %v885_v42 }
  0x52   : > { %v921_v9 = vadd.f32 %v3200_v16, %v3199_v25  ;;  %v943_v20 = vadd.f32 %v3202_v50, %v3201_v6  ;;  %v1053_v12 = vadd.f32 %v899_v21, %v897_v53  ;;  %v3203_v31 = vunpack.c.l.bf16 %v2481_v60 }
  0x53   : > { %v3204_v49 = vunpack.c.l.bf16 %v2505_v29  ;;  %v966_v63 = vadd.f32 %v965_v26, %v853_v4  ;;  %v1075_v22 = vadd.f32 %v911_v51, %v909_v39  ;;  %v988_v27 = vadd.f32 %v987_v1, %v865_v24 }
  0x54   : > { %v922_v56 = vadd.f32 %v921_v9, %v3203_v31  ;;  %v1010_v25 = vadd.f32 %v1009_v37, %v877_v46  ;;  %v1032_v16 = vadd.f32 %v1031_v32, %v889_v15  ;;  %v1054_v10 = vadd.f32 %v1053_v12, %v901_v11 }
  0x55   : > { %v944_v55 = vadd.f32 %v943_v20, %v3204_v49  ;;  %v3205_v17 = vunpack.c.l.bf16 %v2485_v54  ;;  %v3206_v6 = vunpack.c.l.bf16 %v2509_v40  ;;  %v967_v42 = vadd.f32 %v966_v63, %v855_v58 }
  0x56   : > { %v1076_v38 = vadd.f32 %v1075_v22, %v913_v43  ;;  %v989_v23 = vadd.f32 %v988_v27, %v867_v3  ;;  %v1011_v2 = vadd.f32 %v1010_v25, %v879_v30  ;;  %v1033_v31 = vadd.f32 %v1032_v16, %v891_v47 }
  0x57   : > { %v923_v50 = vadd.f32 %v922_v56, %v3205_v17  ;;  %v945_v8 = vadd.f32 %v944_v55, %v3206_v6  ;;  %v1055_v9 = vadd.f32 %v1054_v10, %v903_v44  ;;  %v3207_v20 = vunpack.c.l.bf16 %v2488_v28 }
  0x58   : > { %v3208_v49 = vunpack.c.l.bf16 %v2512_v57  ;;  %v3209_v32 = vunpack.c.l.bf16 %v2542_v59  ;;  %v1077_v46 = vadd.f32 %v1076_v38, %v915_v61  ;;  %v990_v17 = vadd.f32 %v989_v23, %v869_v41 }
  0x59   : > { %v924_v26 = vadd.f32 %v923_v50, %v3207_v20  ;;  %v1012_v11 = vadd.f32 %v1011_v2, %v881_v34  ;;  %v1034_v15 = vadd.f32 %v1033_v31, %v893_v7  ;;  %v1056_v55 = vadd.f32 %v1055_v9, %v905_v62 }
  0x5a   : > { %v946_v37 = vadd.f32 %v945_v8, %v3208_v49  ;;  %v968_v12 = vadd.f32 %v967_v42, %v3209_v32  ;;  %v3210_v58 = vunpack.c.l.bf16 %v2493_v5  ;;  %v3211_v27 = vunpack.c.l.bf16 %v2519_v48 }
  0x5b   : > { %v3212_v3 = vunpack.c.l.bf16 %v2545_v13  ;;  %v1078_v44 = vadd.f32 %v1077_v46, %v917_v14  ;;  %v3213_v47 = vunpack.c.l.bf16 %v2569_v0  ;;  %v1013_v24 = vadd.f32 %v1012_v11, %v883_v33 }
  0x5c   : > { %v925_v63 = vadd.f32 %v924_v26, %v3210_v58  ;;  %v947_v10 = vadd.f32 %v946_v37, %v3211_v27  ;;  %v1035_v30 = vadd.f32 %v1034_v15, %v895_v52  ;;  %v1057_v1 = vadd.f32 %v1056_v55, %v907_v19 }
  0x5d   : > { %v969_v43 = vadd.f32 %v968_v12, %v3212_v3  ;;  %v991_v56 = vadd.f32 %v990_v17, %v3213_v47  ;;  %v1079_v21 = vadd.f32 %v1078_v44, %v919_v35  ;;  %v1014_v18 = vrot.slane %v1013_v24, 4  ;;  %v3215_v3 = vld [vmem:[#allocation27_spill] sm:$0xff] }
  0x5e   : > { %v926_v34 = vrot.slane %v925_v63, 4  ;;  %v948_v41 = vrot.slane %v947_v10, 4  ;;  %v1036_v22 = vrot.slane %v1035_v30, 4  ;;  %v1058_v62 = vrot.slane %v1057_v1, 4 }
  0x5f   : > { %v970_v7 = vrot.slane %v969_v43, 4  ;;  %v992_v53 = vrot.slane %v991_v56, 4  ;;  %v1080_v45 = vrot.slane %v1079_v21, 4  ;;  %v1015_v61 = vadd.f32 %v1014_v18, %v1013_v24 }
  0x60   : > { %v927_v39 = vadd.f32 %v926_v34, %v925_v63  ;;  %v949_v51 = vadd.f32 %v948_v41, %v947_v10  ;;  %v1037_v14 = vadd.f32 %v1036_v22, %v1035_v30  ;;  %v1059_v25 = vadd.f32 %v1058_v62, %v1057_v1  ;;  %v3214_v10 = vld [vmem:[#allocation37_spill] sm:$0xff]  ;;  %v3218_v34 = vld [vmem:[#allocation11_spill] sm:$0xff] }
  0x61   : > { %v971_v36 = vadd.f32 %v970_v7, %v969_v43  ;;  %v993_v4 = vadd.f32 %v992_v53, %v991_v56  ;;  %v1081_v16 = vadd.f32 %v1080_v45, %v1079_v21  ;;  %v1016_v6 = vrot.slane %v1015_v61, 2  ;;  %v3219_v21 = vld [vmem:[#allocation12_spill] sm:$0xff] }
  0x62   : > { %v928_v33 = vrot.slane %v927_v39, 2  ;;  %v950_v52 = vrot.slane %v949_v51, 2  ;;  %v1038_v8 = vrot.slane %v1037_v14, 2  ;;  %v1060_v35 = vrot.slane %v1059_v25, 2 }
  0x63   : > { %v972_v19 = vrot.slane %v971_v36, 2  ;;  %v994_v50 = vrot.slane %v993_v4, 2  ;;  %v1082_v2 = vrot.slane %v1081_v16, 2  ;;  %v1017_v9 = vadd.f32 %v1016_v6, %v1015_v61  ;;  %v3221_v61 = vld [vmem:[#allocation15_spill] sm:$0xff] }
  0x64   : > { %v929_v42 = vadd.f32 %v928_v33, %v927_v39  ;;  %v951_v38 = vadd.f32 %v950_v52, %v949_v51  ;;  %v1039_v20 = vadd.f32 %v1038_v8, %v1037_v14  ;;  %v1061_v26 = vadd.f32 %v1060_v35, %v1059_v25  ;;  %v3224_v8 = vld [vmem:[#allocation18_spill] sm:$0xff] }
  0x65   : > { %v973_v23 = vadd.f32 %v972_v19, %v971_v36  ;;  %v995_v31 = vadd.f32 %v994_v50, %v993_v4  ;;  %v1083_v12 = vadd.f32 %v1082_v2, %v1081_v16  ;;  %v1018_v17 = vrot.slane %v1017_v9, 1  ;;  %v3220_v36 = vld [vmem:[#allocation14_spill] sm:$0xff]  ;;  %v3222_v16 = vld [vmem:[#allocation17_spill] sm:$0xff] }
  0x66   : > { %v930_v49 = vrot.slane %v929_v42, 1  ;;  %v952_v37 = vrot.slane %v951_v38, 1  ;;  %v1040_v11 = vrot.slane %v1039_v20, 1  ;;  %v1062_v15 = vrot.slane %v1061_v26, 1  ;;  %v3254_v19 = vld [vmem:[#allocation53_spill] sm:$0xff]  ;;  %v3255_v51 = vld [vmem:[#allocation54_spill] sm:$0xff] }
  0x67   : > { %v974_v32 = vrot.slane %v973_v23, 1  ;;  %v996_v46 = vrot.slane %v995_v31, 1  ;;  %v1084_v27 = vrot.slane %v1083_v12, 1  ;;  %v2723_v43 = vsel %vm756_vm4, %v3215_v3, %v3214_v10  ;;  %v3235_v10 = vld [vmem:[#allocation33_spill] sm:$0xff] }
  0x68   : > { %v931_v55 = vadd.f32 %v930_v49, %v929_v42  ;;  %v953_v58 = vadd.f32 %v952_v37, %v951_v38  ;;  %3216 = vst [vmem:[#allocation37_spill] sm:$0xff] %v2723_v43  ;;  %v1019_v47 = vadd.f32 %v1018_v17, %v1017_v9  ;;  %v1041_v56 = vadd.f32 %v1040_v11, %v1039_v20  ;;  %v3225_v42 = vld [vmem:[#allocation19_spill] sm:$0xff]  ;;  %v3229_v49 = vld [vmem:[#allocation24_spill] sm:$0xff] }
  0x69   : > { %v975_v63 = vadd.f32 %v974_v32, %v973_v23  ;;  %v997_v44 = vadd.f32 %v996_v46, %v995_v31  ;;  %v1063_v24 = vadd.f32 %v1062_v15, %v1061_v26  ;;  %v2725_v30 = vadd.f32 %v1084_v27, %v1083_v12  ;;  %v3226_v23 = vld [vmem:[#allocation20_spill] sm:$0xff]  ;;  %v3227_v31 = vld [vmem:[#allocation22_spill] sm:$0xff]  ;;  %v3228_v20 = vld [vmem:[#allocation23_spill] sm:$0xff] }
  0x6a   : > { %v1113_v1 = vsel %vm748_vm0, %v953_v58, %v931_v55  ;;  %v826_v41 = vunpack.c.h.bf16 %v3218_v34  ;;  %v828_v53 = vunpack.c.h.bf16 %v3219_v21  ;;  %v830_v18 = vunpack.c.h.bf16 %v2481_v60  ;;  %v3230_v32 = vld [vmem:[#allocation25_spill] sm:$0xff]  ;;  %v3231_v46 = vld [vmem:[#allocation26_spill] sm:$0xff]  ;;  %v3232_v15 = vld [vmem:[#allocation28_spill] sm:$0xff] }
  0x6b   : > { %3217 = vst [vmem:[#allocation27_spill] sm:$0xff] %v2725_v30  ;;  %v1114_v7 = vsel %vm750_vm1, %v975_v63, %v1113_v1  ;;  %v838_v45 = vunpack.c.h.bf16 %v3220_v36  ;;  %v840_v14 = vunpack.c.h.bf16 %v3221_v61  ;;  %v842_v25 = vunpack.c.h.bf16 %v2505_v29  ;;  %v3233_v58 = vld [vmem:[#allocation29_spill] sm:$0xff]  ;;  %v3234_v27 = vld [vmem:[#allocation30_spill] sm:$0xff]  ;;  %v3238_v1 = vld [vmem:[#allocation36_spill] sm:$0xff] }
  0x6c   : > { %v1115_v62 = vsel %vm752_vm2, %v997_v44, %v1114_v7  ;;  %v844_v33 = vunpack.c.h.bf16 %v2509_v40  ;;  %v850_v50 = vunpack.c.h.bf16 %v3222_v16  ;;  %v852_v35 = vunpack.c.h.bf16 %v3224_v8  ;;  %v3236_v44 = vld [vmem:[#allocation34_spill] sm:$0xff]  ;;  %v3242_v61 = vld [vmem:[#allocation41_spill] sm:$0xff]  ;;  %v3253_v40 = vld [vmem:[#allocation52_spill] sm:$0xff] }
  0x6d   : > { %v1116_v4 = vsel %vm754_vm3, %v1019_v47, %v1115_v62  ;;  %v854_v38 = vunpack.c.h.bf16 %v3225_v42  ;;  %v856_v2 = vunpack.c.h.bf16 %v3226_v23  ;;  %v858_v29 = vunpack.c.h.bf16 %v2542_v59  ;;  %v3239_v7 = vld [vmem:[#allocation38_spill] sm:$0xff]  ;;  %v3240_v62 = vld [vmem:[#allocation39_spill] sm:$0xff] }
  0x6e   : > { %v1117_v60 = vsel %vm756_vm4, %v1041_v56, %v1116_v4  ;;  %v862_v9 = vunpack.c.h.bf16 %v3227_v31  ;;  %v864_v26 = vunpack.c.h.bf16 %v3228_v20  ;;  %v866_v37 = vunpack.c.h.bf16 %v3229_v49  ;;  %v3237_v56 = vld [vmem:[#allocation35_spill] sm:$0xff]  ;;  %v3241_v4 = vld [vmem:[#allocation40_spill] sm:$0xff]  ;;  %v3243_v16 = vld [vmem:[#allocation42_spill] sm:$0xff] }
  0x6f   : > { %v2746_v6 = vsel %vm758_vm5, %v1063_v24, %v1117_v60  ;;  %v868_v12 = vunpack.c.h.bf16 %v3230_v32  ;;  %v870_v17 = vunpack.c.h.bf16 %v3231_v46  ;;  %v872_v11 = vunpack.c.h.bf16 %v2569_v0  ;;  %v3244_v42 = vld [vmem:[#allocation43_spill] sm:$0xff]  ;;  %v3245_v31 = vld [vmem:[#allocation44_spill] sm:$0xff]  ;;  %v3246_v49 = vld [vmem:[#allocation45_spill] sm:$0xff] }
  0x70   : > { %3223 = vst [vmem:[#allocation11_spill] sm:$0xff] %v2746_v6  ;;  %v874_v55 = vunpack.c.h.bf16 %v3232_v15  ;;  %v876_v63 = vunpack.c.h.bf16 %v3233_v58  ;;  %v878_v59 = vunpack.c.h.bf16 %v3234_v27  ;;  %v880_v3 = vunpack.c.h.bf16 %v3235_v10  ;;  %v3247_v46 = vld [vmem:[#allocation46_spill] sm:$0xff]  ;;  %v3248_v58 = vld [vmem:[#allocation47_spill] sm:$0xff]  ;;  %v3249_v10 = vld [vmem:[#allocation48_spill] sm:$0xff] }
  0x71   : > { %v882_v47 = vunpack.c.h.bf16 %v3236_v44  ;;  %v884_v24 = vunpack.c.h.bf16 %v3237_v56  ;;  %v886_v34 = vunpack.c.h.bf16 %v3238_v1  ;;  %v888_v21 = vunpack.c.h.bf16 %v3239_v7  ;;  %v3250_v56 = vld [vmem:[#allocation49_spill] sm:$0xff]  ;;  %v3251_v7 = vld [vmem:[#allocation50_spill] sm:$0xff] }
  0x72   : > { %v890_v36 = vunpack.c.h.bf16 %v3240_v62  ;;  %v892_v0 = vunpack.c.h.bf16 %v3241_v4  ;;  %v894_v60 = vunpack.c.h.bf16 %v3242_v61  ;;  %v896_v8 = vunpack.c.h.bf16 %v3243_v16  ;;  %v3252_v4 = vld [vmem:[#allocation51_spill] sm:$0xff] }
  0x73   : > { %v898_v23 = vunpack.c.h.bf16 %v3244_v42  ;;  %v900_v20 = vunpack.c.h.bf16 %v3245_v31  ;;  %v902_v32 = vunpack.c.h.bf16 %v3246_v49  ;;  %v904_v15 = vunpack.c.h.bf16 %v3247_v46 }
  0x74   : > { %v906_v27 = vunpack.c.h.bf16 %v3248_v58  ;;  %v908_v44 = vunpack.c.h.bf16 %v3249_v10  ;;  %v910_v1 = vunpack.c.h.bf16 %v3250_v56  ;;  %v912_v62 = vunpack.c.h.bf16 %v3251_v7 }
  0x75   : > { %v914_v61 = vunpack.c.h.bf16 %v3252_v4  ;;  %v916_v16 = vunpack.c.h.bf16 %v3253_v40  ;;  %v918_v42 = vunpack.c.h.bf16 %v3254_v19  ;;  %v920_v31 = vunpack.c.h.bf16 %v3255_v51 }
  0x76   : > { %v932_v52 = vadd.f32 %v828_v53, %v826_v41  ;;  %v954_v49 = vadd.f32 %v840_v14, %v838_v45  ;;  %v976_v39 = vadd.f32 %v852_v35, %v850_v50  ;;  %v998_v46 = vadd.f32 %v864_v26, %v862_v9 }
  0x77   : > { %v1020_v22 = vadd.f32 %v876_v63, %v874_v55  ;;  %v1042_v58 = vadd.f32 %v888_v21, %v886_v34  ;;  %v1064_v43 = vadd.f32 %v900_v20, %v898_v23  ;;  %v1086_v10 = vadd.f32 %v912_v62, %v910_v1 }
  0x78   : > { %v933_v30 = vadd.f32 %v932_v52, %v830_v18  ;;  %v955_v56 = vadd.f32 %v954_v49, %v842_v25  ;;  %v977_v6 = vadd.f32 %v976_v39, %v854_v38  ;;  %v999_v7 = vadd.f32 %v998_v46, %v866_v37 }
  0x79   : > { %v1021_v13 = vadd.f32 %v1020_v22, %v878_v59  ;;  %v1043_v4 = vadd.f32 %v1042_v58, %v890_v36  ;;  %v1065_v48 = vadd.f32 %v1064_v43, %v902_v32  ;;  %v1087_v40 = vadd.f32 %v1086_v10, %v914_v61 }
  0x7a   : > { %v3256_v19 = vunpack.c.h.bf16 %v2485_v54  ;;  %v956_v51 = vadd.f32 %v955_v56, %v844_v33  ;;  %v978_v41 = vadd.f32 %v977_v6, %v856_v2  ;;  %v1000_v53 = vadd.f32 %v999_v7, %v868_v12  ;;  %v3261_v2 = vld [vmem:[#allocation16_spill] sm:$0xff] }
  0x7b   : > { %v1022_v45 = vadd.f32 %v1021_v13, %v880_v3  ;;  %v1044_v14 = vadd.f32 %v1043_v4, %v892_v0  ;;  %v1066_v50 = vadd.f32 %v1065_v48, %v904_v15  ;;  %v1088_v35 = vadd.f32 %v1087_v40, %v916_v16  ;;  %v3263_v48 = vld [vmem:[#allocation21_spill] sm:$0xff] }
  0x7c   : > { %v934_v5 = vadd.f32 %v933_v30, %v3256_v19  ;;  %v3257_v9 = vunpack.c.h.bf16 %v2488_v28  ;;  %v3258_v39 = vunpack.c.h.bf16 %v2512_v57  ;;  %v979_v22 = vadd.f32 %v978_v41, %v858_v29  ;;  %v3259_v30 = vld [vmem:[#allocation13_spill] sm:$0xff] }
  0x7d   : > { %v1001_v52 = vadd.f32 %v1000_v53, %v870_v17  ;;  %v1023_v43 = vadd.f32 %v1022_v45, %v882_v47  ;;  %v1045_v38 = vadd.f32 %v1044_v14, %v894_v60  ;;  %v1067_v26 = vadd.f32 %v1066_v50, %v906_v27 }
  0x7e   : > { %v935_v18 = vadd.f32 %v934_v5, %v3257_v9  ;;  %v957_v25 = vadd.f32 %v956_v51, %v3258_v39  ;;  %v1089_v54 = vadd.f32 %v1088_v35, %v918_v42  ;;  %v3260_v33 = vunpack.c.h.bf16 %v3259_v30 }
  0x7f   : > { %v3262_v13 = vunpack.c.h.bf16 %v3261_v2  ;;  %v3264_v12 = vunpack.c.h.bf16 %v3263_v48  ;;  %v1002_v28 = vadd.f32 %v1001_v52, %v872_v11  ;;  %v1024_v5 = vadd.f32 %v1023_v43, %v884_v24  ;;  %v3266_v52 = vld [vmem:[#allocation27_spill] sm:$0xff]  ;;  %v2008_v2 = vld [vmem:[%s2286_s23 + $0x158] sm:$0xff] }
  0x80   : > { %v936_v6 = vadd.f32 %v935_v18, %v3260_v33  ;;  %v1046_v63 = vadd.f32 %v1045_v38, %v896_v8  ;;  %v1068_v57 = vadd.f32 %v1067_v26, %v908_v44  ;;  %v1090_v59 = vadd.f32 %v1089_v54, %v920_v31 }
  0x81   : > { %v958_v37 = vadd.f32 %v957_v25, %v3262_v13  ;;  %v980_v55 = vadd.f32 %v979_v22, %v3264_v12  ;;  %v1003_v47 = vrot.slane %v1002_v28, 4  ;;  %v1025_v34 = vrot.slane %v1024_v5, 4  ;;  %v3265_v22 = vld [vmem:[#allocation11_spill] sm:$0xff]  ;;  %v2806_v13 = vld [vmem:[%s2286_s23 + $0x28] sm:$0xff] }
  0x82   : > { %v937_v29 = vrot.slane %v936_v6, 4  ;;  %v1047_v21 = vrot.slane %v1046_v63, 4  ;;  %v1069_v36 = vrot.slane %v1068_v57, 4  ;;  %v1091_v0 = vrot.slane %v1090_v59, 4  ;;  %v2811_v12 = vld [vmem:[%s2286_s23 + $0x30] sm:$0xff] }
  0x83   : > { %v959_v17 = vrot.slane %v958_v37, 4  ;;  %v981_v3 = vrot.slane %v980_v55, 4  ;;  %v1004_v32 = vadd.f32 %v1003_v47, %v1002_v28  ;;  %v1026_v15 = vadd.f32 %v1025_v34, %v1024_v5  ;;  %v2815_v28 = vld [vmem:[%s2286_s23 + $0x38] sm:$0xff]  ;;  %v2007_v47 = vld [vmem:[%s2286_s23 + $0x150] sm:$0xff] }
  0x84   : > { %v938_v60 = vadd.f32 %v937_v29, %v936_v6  ;;  %v1048_v27 = vadd.f32 %v1047_v21, %v1046_v63  ;;  %v1070_v11 = vadd.f32 %v1069_v36, %v1068_v57  ;;  %v1092_v24 = vadd.f32 %v1091_v0, %v1090_v59  ;;  %v2802_v6 = vld [vmem:[%s2286_s23 + $0x20] sm:$0xff]  ;;  %v2824_v29 = vld [vmem:[%s2286_s23 + $0x48] sm:$0xff]  ;;  %v2832_v34 = vld [vmem:[%s2286_s23 + $0x58] sm:$0xff] }
  0x85   : > { %v960_v23 = vadd.f32 %v959_v17, %v958_v37  ;;  %v982_v20 = vadd.f32 %v981_v3, %v980_v55  ;;  %v1005_v62 = vrot.slane %v1004_v32, 2  ;;  %v1027_v61 = vrot.slane %v1026_v15, 2  ;;  %v2819_v63 = vld [vmem:[%s2286_s23 + $0x40] sm:$0xff]  ;;  %v2828_v3 = vld [vmem:[%s2286_s23 + $0x50] sm:$0xff]  ;;  %v2004_v21 = vld [vmem:[%s2286_s23 + $0x138] sm:$0xff] }
  0x86   : > { %v939_v8 = vrot.slane %v938_v60, 2  ;;  %v1049_v16 = vrot.slane %v1048_v27, 2  ;;  %v1071_v42 = vrot.slane %v1070_v11, 2  ;;  %v1093_v31 = vrot.slane %v1092_v24, 2  ;;  %v2837_v0 = vld [vmem:[%s2286_s23 + $0x60] sm:$0xff]  ;;  %v2011_v17 = vld [vmem:[%s2286_s23 + $0x170] sm:$0xff] }
  0x87   : > { %v961_v44 = vrot.slane %v960_v23, 2  ;;  %v983_v1 = vrot.slane %v982_v20, 2  ;;  %v1006_v10 = vadd.f32 %v1005_v62, %v1004_v32  ;;  %v1028_v56 = vadd.f32 %v1027_v61, %v1026_v15  ;;  %v2845_v32 = vld [vmem:[%s2286_s23 + $0x70] sm:$0xff] }
  0x88   : > { %v940_v49 = vadd.f32 %v939_v8, %v938_v60  ;;  %v1050_v7 = vadd.f32 %v1049_v16, %v1048_v27  ;;  %v1072_v4 = vadd.f32 %v1071_v42, %v1070_v11  ;;  %v1094_v40 = vadd.f32 %v1093_v31, %v1092_v24  ;;  %v2850_v11 = vld [vmem:[%s2286_s23 + $0x78] sm:$0xff]  ;;  %v2854_v8 = vld [vmem:[%s2286_s23 + $0x80] sm:$0xff]  ;;  %v2863_v16 = vld [vmem:[%s2286_s23 + $0x90] sm:$0xff] }
  0x89   : > { %v962_v46 = vadd.f32 %v961_v44, %v960_v23  ;;  %v984_v58 = vadd.f32 %v983_v1, %v982_v20  ;;  %v1007_v53 = vrot.slane %v1006_v10, 1  ;;  %v1029_v45 = vrot.slane %v1028_v56, 1  ;;  %v2841_v23 = vld [vmem:[%s2286_s23 + $0x68] sm:$0xff]  ;;  %v2867_v31 = vld [vmem:[%s2286_s23 + $0x98] sm:$0xff]  ;;  %v2003_v62 = vld [vmem:[%s2286_s23 + $0x130] sm:$0xff] }
  0x8a   : > { %v941_v19 = vrot.slane %v940_v49, 1  ;;  %v1051_v14 = vrot.slane %v1050_v7, 1  ;;  %v1073_v50 = vrot.slane %v1072_v4, 1  ;;  %v1095_v35 = vrot.slane %v1094_v40, 1  ;;  %v2858_v1 = vld [vmem:[%s2286_s23 + $0x88] sm:$0xff]  ;;  %v3267_v57 = vld [vmem:[#allocation7_spill] sm:$0xff] }
  0x8b   : > { %v963_v51 = vrot.slane %v962_v46, 1  ;;  %v985_v41 = vrot.slane %v984_v58, 1  ;;  %v1008_v25 = vadd.f32 %v1007_v53, %v1006_v10  ;;  %v2798_v43 = vsel %vm760_vm6, %v3266_v52, %v3265_v22  ;;  %v2899_v22 = vld [vmem:[%s2286_s23 + $0xe8] sm:$0xff] }
  0x8c   : > { %v942_v9 = vadd.f32 %v941_v19, %v940_v49  ;;  %v1030_v38 = vadd.f32 %v1029_v45, %v1028_v56  ;;  %v1052_v26 = vadd.f32 %v1051_v14, %v1050_v7  ;;  %v1074_v54 = vadd.f32 %v1073_v50, %v1072_v4  ;;  %v2876_v56 = vld [vmem:[%s2286_s23 + $0xa8] sm:$0xff]  ;;  %v2880_v4 = vld [vmem:[%s2286_s23 + $0xb0] sm:$0xff]  ;;  %v2884_v19 = vld [vmem:[%s2286_s23 + $0xb8] sm:$0xff] }
  0x8d   : > { %v964_v18 = vadd.f32 %v963_v51, %v962_v46  ;;  %v986_v39 = vadd.f32 %v985_v41, %v984_v58  ;;  %v1096_v30 = vadd.f32 %v1095_v35, %v1094_v40  ;;  %v473_v55 = vunpack.c.h.bf16 %v2811_v12  ;;  %v2871_v46 = vld [vmem:[%s2286_s23 + $0xa0] sm:$0xff]  ;;  %v1990_v45 = vld [vmem:[%s2286_s23 + $0xc8] sm:$0xff]  ;;  %v1991_v50 = vld [vmem:[%s2286_s23 + $0xd0] sm:$0xff] }
  0x8e   : > { %v475_v5 = vunpack.c.h.bf16 %v2815_v28  ;;  %v485_v60 = vunpack.c.h.bf16 %v2837_v0  ;;  %v487_v20 = vunpack.c.h.bf16 %v2841_v23  ;;  %v1989_v41 = vld [vmem:[%s2286_s23 + $0xc0] sm:$0xff]  ;;  %v511_v14 = vunpack.c.h.bf16 %v1990_v45  ;;  %v2913_v45 = vld [vmem:[%s2286_s23 + $0x118] sm:$0xff]  ;;  %v2006_v40 = vld [vmem:[%s2286_s23 + $0x148] sm:$0xff] }
  0x8f   : > { %v1120_v33 = vsel %vm748_vm0, %v964_v18, %v942_v9  ;;  %v509_v53 = vunpack.c.h.bf16 %v1989_v41  ;;  %v513_v35 = vunpack.c.h.bf16 %v1991_v50  ;;  %v2891_v9 = vld [vmem:[%s2286_s23 + $0xd8] sm:$0xff]  ;;  %v539_v37 = vunpack.c.h.bf16 %v2004_v21  ;;  %v2005_v50 = vld [vmem:[%s2286_s23 + $0x140] sm:$0xff]  ;;  %v2010_v24 = vld [vmem:[%s2286_s23 + $0x168] sm:$0xff] }
  0x90   : > { %v1121_v48 = vsel %vm750_vm1, %v986_v39, %v1120_v33  ;;  %v2895_v39 = vld [vmem:[%s2286_s23 + $0xe0] sm:$0xff]  ;;  %v547_v18 = vunpack.c.h.bf16 %v2008_v2  ;;  %v553_v58 = vunpack.c.h.bf16 %v2011_v17  ;;  %v3268_v21 = vunpack.c.h.bf16 %v3267_v57  ;;  %v3269_v49 = vld [vmem:[#allocation8_spill] sm:$0xff] }
  0x91   : > { %v1122_v59 = vsel %vm752_vm2, %v1008_v25, %v1121_v48  ;;  %v1997_v48 = vld [vmem:[%s2286_s23 + $0x100] sm:$0xff]  ;;  %v541_v25 = vunpack.c.h.bf16 %v2005_v50  ;;  %v3270_v42 = vunpack.c.h.bf16 %v3269_v49  ;;  %v611_v2 = vadd.f32 %v487_v20, %v485_v60 }
  0x92   : > { %v1123_v36 = vsel %vm754_vm3, %v1030_v38, %v1122_v59  ;;  %v1995_v38 = vld [vmem:[%s2286_s23 + $0xf0] sm:$0xff]  ;;  %v525_v59 = vunpack.c.h.bf16 %v1997_v48  ;;  %v2001_v48 = vld [vmem:[%s2286_s23 + $0x120] sm:$0xff]  ;;  %v3271_v17 = vunpack.c.h.bf16 %v2863_v16  ;;  %v655_v57 = vadd.f32 %v511_v14, %v509_v53  ;;  %v3278_v16 = vld [vmem:[#allocation10_spill] sm:$0xff] }
  0x93   : > { %v1124_v27 = vsel %vm756_vm4, %v1052_v26, %v1123_v36  ;;  %v521_v26 = vunpack.c.h.bf16 %v1995_v38  ;;  %v1998_v36 = vld [vmem:[%s2286_s23 + $0x108] sm:$0xff]  ;;  %v533_v52 = vunpack.c.h.bf16 %v2001_v48  ;;  %v2009_v48 = vld [vmem:[%s2286_s23 + $0x160] sm:$0xff]  ;;  %v567_v50 = vadd.f32 %v3270_v42, %v3268_v21 }
  0x94   : > { %v1125_v61 = vsel %vm758_vm5, %v1074_v54, %v1124_v27  ;;  %v1996_v54 = vld [vmem:[%s2286_s23 + $0xf8] sm:$0xff]  ;;  %v527_v27 = vunpack.c.h.bf16 %v1998_v36  ;;  %v2002_v36 = vld [vmem:[%s2286_s23 + $0x128] sm:$0xff]  ;;  %v549_v7 = vunpack.c.h.bf16 %v2009_v48  ;;  %v3275_v28 = vunpack.c.h.bf16 %v2819_v63 }
  0x95   : > { %v1126_v10 = vsel %vm760_vm6, %v1096_v30, %v1125_v61  ;;  %v523_v30 = vunpack.c.h.bf16 %v1996_v54  ;;  %v2909_v61 = vld [vmem:[%s2286_s23 + $0x110] sm:$0xff]  ;;  %v535_v51 = vunpack.c.h.bf16 %v2002_v36  ;;  %v551_v36 = vunpack.c.h.bf16 %v2010_v24 }
  0x96   : > { %v529_v41 = vunpack.c.h.bf16 %v2909_v61  ;;  %v537_v61 = vunpack.c.h.bf16 %v2003_v62  ;;  %v2012_v62 = vld [vmem:[%s2286_s23 + $0x178] sm:$0xff]  ;;  %v3272_v24 = vunpack.c.h.bf16 %v2867_v31  ;;  %v3277_v60 = vunpack.c.h.bf16 %v2871_v46  ;;  %s1628_s23 = sshll.u32 %s370_s12, 4  ;;  %s3042_s23 = int_to_ptr.vmem [resolvable:$true] %s1628_s23 }
  0x97   : > { %v555_v15 = vunpack.c.h.bf16 %v2012_v62  ;;  %v699_v48 = vadd.f32 %v535_v51, %v533_v52  ;;  %v656_v20 = vadd.f32 %v655_v57, %v513_v35  ;;  %v3279_v31 = vunpack.c.h.bf16 %v3278_v16  ;;  %s2013_s20 = scalar_lea.vmem %s3042_s23, 128  ;;  %p2020_p2 = scmp.lt.s32.totalorder %s3042_s23, %s2018_s21 }
  0x98   : > { %v3282_v52 = vunpack.c.h.bf16 %v2876_v56  ;;  %v3284_v35 = vunpack.c.h.bf16 %v2802_v6  ;;  %v3288_v56 = vunpack.c.h.bf16 %v2895_v39  ;;  %p2014_p13 = scmp.ne.s32.totalorder %s3042_s23, %s2013_s20  ;;  %p2021_p3 = scmp.lt.s32.totalorder %s2019_s25, %s2013_s20 }
  0x99   : > { %v700_v14 = vadd.f32 %v699_v48, %v537_v61 }
  0x9a   : > { %p2015_p0 = pnand %p2014_p13, %p2182_p4  ;;  %p2022_p5 = por %p2021_p3, %p2020_p2 }
  0x9c   : > { %p2016_p1 = pneg %p2015_p0 }
  0x9e   : > { %p2023_p6 = pnand %p2022_p5, %p2016_p1 }
  0xa7   : > { %v2904_v33 = vpop.permute.xlu0 %1142 }
  0xa8   : > { %v2918_v38 = vmul.f32 %v2904_v33, %v2798_v43  ;;  %v1152_v54 = vmul.f32 %v2904_v33, %v1126_v10  ;;  %v543_v43 = vunpack.c.h.bf16 %v2006_v40  ;;  %v545_v10 = vunpack.c.h.bf16 %v2007_v47 }
  0xa9   : > { %v589_v47 = vadd.f32 %v475_v5, %v473_v55  ;;  %v633_v40 = vadd.f32 %v3272_v24, %v3271_v17  ;;  %v3276_v5 = vunpack.c.h.bf16 %v2845_v32 }
  0xaa   : > { %v1154_v44 = vpack.c.bf16 %v1152_v54, %v1152_v54  ;;  %v3273_v54 = vld [vmem:[#allocation9_spill] sm:$0xff]  ;;  %v721_v12 = vadd.f32 %v547_v18, %v545_v10  ;;  %v3281_v18 = vunpack.c.h.bf16 %v2850_v11  ;;  %v3287_v11 = vunpack.c.h.bf16 %v2880_v4 }
  0xab   : > { %v3274_v49 = vunpack.c.h.bf16 %v3273_v54  ;;  %v590_v55 = vadd.f32 %v589_v47, %v3275_v28  ;;  %v612_v0 = vadd.f32 %v611_v2, %v3276_v5  ;;  %v634_v23 = vadd.f32 %v633_v40, %v3277_v60 }
  0xac   : > { %1347 = vmatprep.mubr.bf16.mxu0 %v1154_v44  ;;  %v677_v44 = vadd.f32 %v523_v30, %v521_v26  ;;  %v722_v21 = vadd.f32 %v721_v12, %v549_v7  ;;  %v3280_v26 = vunpack.c.h.bf16 %v2824_v29  ;;  %v3283_v30 = vunpack.c.h.bf16 %v2891_v9 }
  0xad   : > { %v568_v42 = vadd.f32 %v567_v50, %v3274_v49  ;;  %v613_v63 = vadd.f32 %v612_v0, %v3281_v18  ;;  %v635_v32 = vadd.f32 %v634_v23, %v3282_v52  ;;  %v701_v47 = vadd.f32 %v700_v14, %v539_v37 }
  0xae   : > { %v678_v53 = vadd.f32 %v677_v44, %v525_v59  ;;  %v591_v51 = vadd.f32 %v590_v55, %v3280_v26  ;;  %v657_v46 = vadd.f32 %v656_v20, %v3283_v30  ;;  %v723_v59 = vadd.f32 %v722_v21, %v551_v36 }
  0xaf   : > { %v569_v62 = vadd.f32 %v568_v42, %v3279_v31  ;;  %v3285_v7 = vunpack.c.h.bf16 %v2828_v3  ;;  %v3286_v29 = vunpack.c.h.bf16 %v2854_v8  ;;  %v636_v17 = vadd.f32 %v635_v32, %v3287_v11 }
  0xb0   : > { %v679_v50 = vadd.f32 %v678_v53, %v527_v27  ;;  %v658_v24 = vadd.f32 %v657_v46, %v3288_v56  ;;  %v3289_v9 = vunpack.c.h.bf16 %v2806_v13  ;;  %v702_v57 = vadd.f32 %v701_v47, %v541_v25 }
  0xb1   : > { %v570_v10 = vadd.f32 %v569_v62, %v3284_v35  ;;  %v592_v61 = vadd.f32 %v591_v51, %v3285_v7  ;;  %v614_v2 = vadd.f32 %v613_v63, %v3286_v29  ;;  %v724_v27 = vadd.f32 %v723_v59, %v553_v58  ;;  %v3295_v7 = vld [vmem:[#allocation37_spill] sm:$0xff] }
  0xb2   : > { %v680_v6 = vadd.f32 %v679_v50, %v529_v41  ;;  %v3290_v37 = vunpack.c.h.bf16 %v2832_v34  ;;  %v3291_v3 = vunpack.c.h.bf16 %v2858_v1  ;;  %v3292_v8 = vunpack.c.h.bf16 %v2884_v19 }
  0xb3   : > { %v571_v40 = vadd.f32 %v570_v10, %v3289_v9  ;;  %v3293_v4 = vunpack.c.h.bf16 %v2899_v22  ;;  %v3294_v44 = vunpack.c.h.bf16 %v2913_v45  ;;  %v703_v48 = vadd.f32 %v702_v57, %v543_v43 }
  0xb4   : > { %v593_v36 = vadd.f32 %v592_v61, %v3290_v37  ;;  %v615_v54 = vadd.f32 %v614_v2, %v3291_v3  ;;  %v637_v49 = vadd.f32 %v636_v17, %v3292_v8  ;;  %v725_v41 = vadd.f32 %v724_v27, %v555_v15  ;;  %v3296_v61 = vld [vmem:[#allocation31_spill] sm:$0xff]  ;;  %v3297_v3 = vld [vmem:[#allocation32_spill] sm:$0xff] }
  0xb5   : > { %v659_v42 = vadd.f32 %v658_v24, %v3293_v4  ;;  %v572_v39 = vrot.slane %v571_v40, 4  ;;  %v681_v13 = vadd.f32 %v680_v6, %v3294_v44  ;;  %v704_v1 = vrot.slane %v703_v48, 4  ;;  %v1959_v6 = vld [vmem:[%s3093_s6] sm:$0xff]  }
  0xb6   : > { %v594_v25 = vrot.slane %v593_v36, 4  ;;  %v616_v58 = vrot.slane %v615_v54, 4  ;;  %v638_v12 = vrot.slane %v637_v49, 4  ;;  %v726_v5 = vrot.slane %v725_v41, 4 }
  0xb7   : > { %v660_v34 = vrot.slane %v659_v42, 4  ;;  %v573_v28 = vadd.f32 %v572_v39, %v571_v40  ;;  %v682_v55 = vrot.slane %v681_v13, 4  ;;  %v705_v16 = vadd.f32 %v704_v1, %v703_v48  ;;  %v1963_v1 = vld [vmem:[%s3093_s6 + $0x20] sm:$0xff]  }
  0xb8   : > { %v595_v0 = vadd.f32 %v594_v25, %v593_v36  ;;  %v617_v19 = vadd.f32 %v616_v58, %v615_v54  ;;  %v639_v60 = vadd.f32 %v638_v12, %v637_v49  ;;  %v727_v31 = vadd.f32 %v726_v5, %v725_v41  ;;  %v1961_v58 = vld [vmem:[%s3093_s6 + $0x10] sm:$0xff]  }
  0xb9   : > { %v661_v23 = vadd.f32 %v660_v34, %v659_v42  ;;  %v574_v22 = vrot.slane %v573_v28, 2  ;;  %v683_v20 = vadd.f32 %v682_v55, %v681_v13  ;;  %v706_v21 = vrot.slane %v705_v16, 2  ;;  %v1962_v55 = vld [vmem:[%s3093_s6 + $0x18] sm:$0xff]   ;;  %v1965_v5 = vld [vmem:[%s3093_s6 + $0x30] sm:$0xff]  }
  0xba   : > { %v596_v45 = vrot.slane %v595_v0, 2  ;;  %v618_v62 = vrot.slane %v617_v19, 2  ;;  %v640_v43 = vrot.slane %v639_v60, 2  ;;  %v728_v26 = vrot.slane %v727_v31, 2 }
  0xbb   : > { %v662_v15 = vrot.slane %v661_v23, 2  ;;  %v575_v53 = vadd.f32 %v574_v22, %v573_v28  ;;  %v684_v14 = vrot.slane %v683_v20, 2  ;;  %v707_v46 = vadd.f32 %v706_v21, %v705_v16 }
  0xbc   : > { %v597_v51 = vadd.f32 %v596_v45, %v595_v0  ;;  %v619_v18 = vadd.f32 %v618_v62, %v617_v19  ;;  %v641_v63 = vadd.f32 %v640_v43, %v639_v60  ;;  %v729_v35 = vadd.f32 %v728_v26, %v727_v31  ;;  %v1966_v0 = vld [vmem:[%s3093_s6 + $0x38] sm:$0xff]   ;;  %v1780_v43 = vld [vmem:[%s3092_s5] ss:$0 sm:$0xff] }
  0xbd   : > { %v663_v52 = vadd.f32 %v662_v15, %v661_v23  ;;  %v576_v32 = vrot.slane %v575_v53, 1  ;;  %v685_v30 = vadd.f32 %v684_v14, %v683_v20  ;;  %v759_v29 = vsel %vm758_vm5, %v3296_v61, %v3295_v7 }
  0xbe   : > { %v598_v10 = vrot.slane %v597_v51, 1  ;;  %v620_v50 = vrot.slane %v619_v18, 1  ;;  %v642_v47 = vrot.slane %v641_v63, 1  ;;  %v708_v17 = vrot.slane %v707_v46, 1 }
  0xbf   : > { %v664_v59 = vrot.slane %v663_v52, 1  ;;  %v577_v2 = vadd.f32 %v576_v32, %v575_v53  ;;  %v686_v11 = vrot.slane %v685_v30, 1  ;;  %v730_v40 = vrot.slane %v729_v35, 1 }
  0xc0   : > { %v599_v56 = vadd.f32 %v598_v10, %v597_v51  ;;  %v621_v24 = vadd.f32 %v620_v50, %v619_v18  ;;  %v643_v9 = vadd.f32 %v642_v47, %v641_v63  ;;  %v1153_v27 = vpack.c.bf16 %v2918_v38, %v2918_v38  ;;  %v1960_v38 = vld [vmem:[%s3093_s6 + $0x8] sm:$0xff]   ;;  %v1781_v51 = vld [vmem:[%s3094_s7] ss:$0 sm:$0xff] }
  0xc1   : > { %v665_v57 = vadd.f32 %v664_v59, %v663_v52  ;;  %v687_v37 = vadd.f32 %v686_v11, %v685_v30  ;;  %v761_v54 = vsel %vm760_vm6, %v3297_v3, %v759_v29  ;;  %v709_v8 = vadd.f32 %v708_v17, %v707_v46 }
  0xc2   : > { %v762_v36 = vsel %vm748_vm0, %v599_v56, %v577_v2  ;;  %1348 = vmatmul.mubr.bf16.vlgmr.msra.gmra.mrb[0].mxu0 %v1153_v27  ;;  %v2094_v4 = vmov 0.0   ;;  %v731_v42 = vadd.f32 %v730_v40, %v729_v35  ;;  %v1145_v13 = vmul.f32 %v2904_v33, %v761_v54 }
  0xc3   : > { %v763_v49 = vsel %vm750_vm1, %v621_v24, %v762_v36  ;;  %1847 = vmatprep.subr.bf16.mxu0 %v2094_v4  ;;  %1863 = vmatprep.mubr.msk.bf16.mxu0 %vm2095_vm7, %v2094_v4 }
  0xc4   : > { %v764_v39 = vsel %vm752_vm2, %v643_v9, %v763_v49  ;;  %1848 = vmatpush3.bf16.msra.mxu0 %v1959_v6  ;;  %v1147_v34 = vpack.c.bf16 %v1145_v13, %v1145_v13 }
  0xc5   : > { %v765_v44 = vsel %vm754_vm3, %v665_v57, %v764_v39  ;;  %1849 = vmatprep.subr.bf16.mxu0 %v2094_v4 }
  0xc6   : > { %v766_v48 = vsel %vm756_vm4, %v687_v37, %v765_v44 }
  0xc7   : > { %v767_v41 = vsel %vm758_vm5, %v709_v8, %v766_v48 }
  0xc8   : > { %v768_v25 = vsel %vm760_vm6, %v731_v42, %v767_v41  ;;  %1850 = vmatpush3.bf16.msra.mxu0 %v1960_v38 }
  0xc9   : > { %v1146_v12 = vmul.f32 %v2904_v33, %v768_v25  ;;  %1851 = vmatprep.subr.bf16.mxu0 %v2094_v4  ;;  %v1964_v33 = vld [vmem:[%s3093_s6 + $0x28] sm:$0xff]  }
  0xcb   : > { %v1148_v28 = vpack.c.bf16 %v1146_v12, %v1146_v12 }
  0xcc   : > { %1852 = vmatpush3.bf16.msra.mxu0 %v1961_v58 }
  0xcd   : > { %1483 = vmatprep.mubr.bf16.mxu1 %v1148_v28  ;;  %1853 = vmatprep.subr.bf16.mxu0 %v2094_v4 }
  0xce   : > { %1484 = vmatmul.mubr.bf16.vlgmr.msra.gmra.mrb[0].mxu1 %v1147_v34 }
  0xd0   : > { %1854 = vmatpush3.bf16.msra.mxu0 %v1962_v55 }
  0xd1   : > { %1855 = vmatprep.subr.bf16.mxu0 %v2094_v4 }
  0xd4   : > { %1856 = vmatpush3.bf16.msra.mxu0 %v1963_v1 }
  0xd5   : > { %1857 = vmatprep.subr.bf16.mxu0 %v2094_v4 }
  0xd8   : > { %1858 = vmatpush3.bf16.msra.mxu0 %v1964_v33 }
  0xd9   : > { %1859 = vmatprep.subr.bf16.mxu0 %v2094_v4 }
  0xdc   : > { %1860 = vmatpush3.bf16.msra.mxu0 %v1965_v5 }
  0xdd   : > { %1861 = vmatprep.subr.bf16.mxu0 %v2094_v4 }
  0xe0   : > { %1862 = vmatpush3.bf16.msra.mxu0 %v1966_v0 }
 0x195   : > { %v1810_v19 = vpop.f32.mrb[0].mxu0 }
 0x196   : > { %v1811_v60 = vpop.f32.mrb[1].mxu0 }
 0x197   : > { %v1812_v23 = vadd.f32 %v1811_v60, %v1810_v19  ;;  %v1813_v22 = vpop.f32.mrb[2].mxu0 }
 0x198   : > { %v1814_v20 = vpop.f32.mrb[3].mxu0 }
 0x1a1   : > { %v1832_v16 = vpop.f32.mrb[0].mxu1 }
 0x1a2   : > { %v1833_v31 = vpop.f32.mrb[1].mxu1 }
 0x1a3   : > { %v1834_v45 = vadd.f32 %v1833_v31, %v1832_v16  ;;  %v1835_v62 = vpop.f32.mrb[2].mxu1 }
 0x1a4   : > { %v1836_v15 = vpop.f32.mrb[3].mxu1 }
 0x1a5   : > { %v1486_v53 = vadd.f32 %v1834_v45, %v1812_v23 }
 0x1a7   : > { %v1498_v14 = vadd.f32 %v1780_v43, %v1486_v53 }
 0x1a9   : > { %v1499_v21 = vmax.f32 %v1498_v14, 0.0 }
 0x1ab   : > { %v1500_v26 = vpack.c.bf16 %v1499_v21, %v1499_v21 }
 0x1ad   : > { %1864 = vmatmul.mubr.bf16.vlgmr.msra.gmra.mrb[4].mxu0 %v1500_v26 }
 0x280   : > { %v1606_v18 = vpop.f32.mrb[4].mxu0 }
 0x281   : > { %v1607_v63 = vadd.f32 %v1781_v51, %v1606_v18  ;;  %v1865_v52 = vpop.f32.mrb[5].mxu0 }
 0x282   : > { %v1609_v32 = vpop.f32.mrb[6].mxu0 }
 0x283   : > { %v1866_v30 = vpop.f32.mrb[7].mxu0  ;;  %1613 = vst.msk [vmem:[%s370_s12] sm:$0xff] %vm1612_vm8, %v1607_v63 }
 0x284   : > { %2026 = shalt.err (!%p2023_p6)
}
 0x285   : > { %s2027_s24 = scalar_lea.hbm %s3040_s19, 128  ;;  %s2031_s12 = scalar_lea.hbm %s3095_s8, 256 }
 0x286   : > { %p2028_p7 = scmp.ne.s32.totalorder %s3040_s19, %s2027_s24  ;;  %p2032_p11 = scmp.lt.u32.totalorder %s3040_s19, %s3095_s8 }
 0x287   : > { %p2033_p12 = scmp.lt.u32.totalorder %s2031_s12, %s2027_s24  ;;  %p2035_p0 = scmp.lt.u32.totalorder %s2027_s24, %s3040_s19 }
 0x288   : > { %p2029_p9 = pnand %p2028_p7, %p2182_p4 }
 0x289   : > { %p2034_p13 = por %p2033_p12, %p2032_p11 }
 0x28a   : > { %p2030_p10 = pneg %p2029_p9 }
 0x28b   : > { %p2036_p1 = por %p2035_p0, %p2034_p13 }
 0x28d   : > { %p2037_p2 = pnand %p2036_p1, %p2030_p10 }
 0x28f   : > { %2040 = shalt.err (!%p2037_p2)
}
 0x290   : > { %1868 = dma.vmem_to_hbm [thread:$0]  (%p2182_p4), %s3042_s23, 128, %s3040_s19, %s1615_s30  }
 0x291 PF: > { %p1874_p3 = scmp.ge.s32.totalorder %s2091_s10, 2  ;;  %s1640_s20 = sand.u32 1, %s2071_s27  }
 0x292   : > { %s1641_s22 = scalar_lea.sflag [#allocation5], %s1640_s20 }
 0x293   : > { %p1871_p5 = pnand %p1874_p3, %p2189_p8 }
 0x295   : > { %2066 = dma.done.wait (!%p1871_p5), %s1641_s22, 128  }
 0x296   : > { %2068 = vsyncadd (!%p1871_p5), %s1641_s22, 4294967168  ;;  %s21_s10 = sadd.s32 1, %s2091_s10   ;;  %s3298_s27 = smov %s2075_s28 }
 0x297   : > { %p18_p6 = scmp.ge.s32.totalorder %s21_s10, 4   ;;  %s3299_s28 = smov %s2079_s29 }
 0x298   : > { %s3300_s29 = smov %s2195_s18  ;;  %s3301_s30 = smov %s2087_s9 }
 0x299   : > { %s3302_s9 = smov %s3304_s13  ;;  %20 = sbr.rel (!%p18_p6) target bundleno = 4 (0x4), region = 101 }
 0x2a0   :  { %1646 = vsyncpa [#allocation5], 1 }
 0x2a1   :  { %1648 = vsyncpa [#allocation5 + $0x1], 1 }

</bundles_post_ra>
